<compile_context>
chip_gen: v6e
topology: v6e:2x2x1
jax: 0.10.0
libtpu: 0.0.40
codegen_flags: <defaults>
</compile_context>

<pallas_src>
import jax
import jax.numpy as jnp
from jax.experimental import pallas as pl
from jax.experimental.pallas import tpu as pltpu

NEG_SLOPE = 0.01
LANE = 128
SUBLANE = 16  # bf16 sublane packing


def mlp_kernel(x_ref,
               w1_ref, b1_ref,
               w2_ref, b2_ref,
               w3_ref, b3_ref,
               w4_ref, b4_ref,
               out_ref):
    # Cast x in-kernel (wrapper hands in f32; avoids a separate XLA cast pass).
    x = x_ref[...].astype(jnp.bfloat16)

    # Layer 1: Linear+BN folded into (w1', b1'); LeakyReLU. Dropout = identity (eval).
    h = jnp.dot(x, w1_ref[...], preferred_element_type=jnp.float32)
    h = h + b1_ref[...]
    h = jnp.maximum(h, NEG_SLOPE * h)

    # Layer 2
    h = jnp.dot(h.astype(jnp.bfloat16), w2_ref[...],
                preferred_element_type=jnp.float32)
    h = h + b2_ref[...]
    h = jnp.maximum(h, NEG_SLOPE * h)

    # Layer 3
    h = jnp.dot(h.astype(jnp.bfloat16), w3_ref[...],
                preferred_element_type=jnp.float32)
    h = h + b3_ref[...]
    h = jnp.maximum(h, NEG_SLOPE * h)

    # Layer 4 (head): bf16 MXU inputs, f32 accumulation.
    y = jnp.dot(h.astype(jnp.bfloat16), w4_ref[...],
                preferred_element_type=jnp.float32) + b4_ref[...]
    out_ref[...] = y.astype(out_ref.dtype)
    # TODO(synk): training-mode dropout (pltpu.prng_random_bits Bernoulli mask) and
    # batch-statistics BatchNorm are not implemented; eval-mode semantics only.


def _round_up(v, m):
    return ((v + m - 1) // m) * m


def _const_spec(shape):
    """Grid-invariant (resident) block: constant index_map, single-buffered."""
    try:
        return pl.BlockSpec(shape, lambda i: (0, 0), pipeline_mode=pl.Buffered(1))
    except TypeError:  # older BlockSpec without pipeline_mode kwarg
        return pl.BlockSpec(shape, lambda i: (0, 0))


def output_mlp(x, params, *, eps=1e-5, block_b=512):
    """x: (B, inp_size) float32. params: dict of weights (see init_params)."""
    B, D = x.shape
    H1 = params["w1"].shape[1]
    H2 = params["w2"].shape[1]
    H3 = params["w3"].shape[1]
    O = params["w4"].shape[1]

    # Fold BN (eval, running stats) + linear bias into the weight matrices.
    def fold(w, b, gamma, beta, mean, var):
        s = gamma / jnp.sqrt(var + eps)
        return w * s[None, :], b * s + (beta - mean * s)

    w1, b1 = fold(params["w1"], params["b1"], params["gamma1"], params["beta1"],
                  params["mean1"], params["var1"])
    w2, b2 = fold(params["w2"], params["b2"], params["gamma2"], params["beta2"],
                  params["mean2"], params["var2"])
    w3, b3 = fold(params["w3"], params["b3"], params["gamma3"], params["beta3"],
                  params["mean3"], params["var3"])
    w4, b4 = params["w4"], params["b4"]

    # Lane-dense output: pad out_size up to a multiple of 128 (sliced back below).
    O_pad = max(LANE, _round_up(O, LANE))
    if O_pad != O:
        w4 = jnp.pad(w4, ((0, 0), (0, O_pad - O)))
        b4 = jnp.pad(b4, (0, O_pad - O))

    # Adaptive batch tile:
    #   - multiple of 16 (sublane alignment for the in-kernel bf16 x),
    #   - ~B/2 for mid-size batches so the grid has >= 2 steps (v7x: 2 TCs),
    #   - capped at block_b so intermediates stay well inside scoped VMEM
    #     (v5e 16 MiB default / v7x 64 MiB physical both covered with the
    #     raised vmem_limit_bytes below).
    TB = max(SUBLANE, min(block_b, _round_up(pl.cdiv(B, 2), SUBLANE)))
    B_pad = _round_up(B, TB)
    x_in = x if B_pad == B else jnp.pad(x, ((0, B_pad - B), (0, 0)))
    grid = (B_pad // TB,)

    row = lambda v: v.reshape(1, -1).astype(jnp.float32)
    bf16 = lambda a: a.astype(jnp.bfloat16)

    out = pl.pallas_call(
        mlp_kernel,
        out_shape=jax.ShapeDtypeStruct((B_pad, O_pad), jnp.float32),
        grid=grid,
        in_specs=[
            pl.BlockSpec((TB, D), lambda i: (i, 0)),       # x (batch-tiled, f32)
            _const_spec((D, H1)), _const_spec((1, H1)),    # w1', b1'
            _const_spec((H1, H2)), _const_spec((1, H2)),   # w2', b2'
            _const_spec((H2, H3)), _const_spec((1, H3)),   # w3', b3'
            _const_spec((H3, O_pad)), _const_spec((1, O_pad)),  # w4 (bf16), b4
        ],
        out_specs=pl.BlockSpec((TB, O_pad), lambda i: (i, 0)),
        compiler_params=pltpu.CompilerParams(
            dimension_semantics=("parallel",),
            vmem_limit_bytes=48 * 1024 * 1024),
    )(
        x_in,
        bf16(w1), row(b1),
        bf16(w2), row(b2),
        bf16(w3), row(b3),
        bf16(w4), row(b4),
    )
    return out[:B, :O]


def init_params(key, inp_size, out_size):
    """PyTorch-style init: kaiming_uniform_(a=0.01, leaky_relu) on weights, zero
    biases, BN gamma=1 / beta=0; running stats slightly perturbed so the folded
    BN affine is non-trivial (reference uses the same values)."""
    dims = [inp_size, 1024, 512, 256, out_size]
    ks = jax.random.split(key, 16)
    p = {}
    for li in range(4):
        fin, fout = dims[li], dims[li + 1]
        gain = (2.0 / (1.0 + 0.01 ** 2)) ** 0.5
        bound = gain * (3.0 / fin) ** 0.5
        p[f"w{li + 1}"] = jax.random.uniform(ks[2 * li], (fin, fout), jnp.float32,
                                             -bound, bound)
        p[f"b{li + 1}"] = jnp.zeros((fout,), jnp.float32)
    for bi, h in enumerate([1024, 512, 256], start=1):
        p[f"gamma{bi}"] = jnp.ones((h,), jnp.float32)
        p[f"beta{bi}"] = jnp.zeros((h,), jnp.float32)
        p[f"mean{bi}"] = 0.1 * jax.random.normal(ks[8 + 2 * bi], (h,), jnp.float32)
        p[f"var{bi}"] = 1.0 + 0.1 * jax.random.uniform(ks[9 + 2 * bi], (h,), jnp.float32)
    return p


def reference(x, params, eps=1e-5):
    def bn(z, i):
        s = params[f"gamma{i}"] / jnp.sqrt(params[f"var{i}"] + eps)
        return (z - params[f"mean{i}"]) * s + params[f"beta{i}"]

    lrelu = lambda z: jnp.where(z > 0, z, NEG_SLOPE * z)
    h = lrelu(bn(x @ params["w1"] + params["b1"], 1))
    h = lrelu(bn(h @ params["w2"] + params["b2"], 2))
    h = lrelu(bn(h @ params["w3"] + params["b3"], 3))
    return h @ params["w4"] + params["b4"]


if __name__ == "__main__":
    key = jax.random.PRNGKey(0)
    k_param, k_x = jax.random.split(key)

    batch, inp_size, out_size = 16, 32, 8
    params = init_params(k_param, inp_size, out_size)
    x = jax.random.normal(k_x, (batch, inp_size), jnp.float32)

    y = output_mlp(x, params)
    y = jax.block_until_ready(y)

    y_ref = reference(x, params)
    assert y.shape == (batch, out_size)
    # All four matmuls use bf16 MXU inputs -> loosened tolerance vs pure-f32 ref.
    err = float(jnp.max(jnp.abs(y - y_ref)))
    assert jnp.allclose(y, y_ref, atol=5e-2, rtol=5e-2), err

    print("KERNEL_OK")
</pallas_src>

<mosaic_0001>
module attributes {stable_mosaic.version = 11 : i64} {
  func.func @mlp_kernel(%arg0: i32, %arg1: memref<16x32xf32, #tpu.memory_space<vmem>>, %arg2: memref<32x1024xbf16, #tpu.memory_space<vmem>>, %arg3: memref<1x1024xf32, #tpu.memory_space<vmem>>, %arg4: memref<1024x512xbf16, #tpu.memory_space<vmem>>, %arg5: memref<1x512xf32, #tpu.memory_space<vmem>>, %arg6: memref<512x256xbf16, #tpu.memory_space<vmem>>, %arg7: memref<1x256xf32, #tpu.memory_space<vmem>>, %arg8: memref<256x128xbf16, #tpu.memory_space<vmem>>, %arg9: memref<1x128xf32, #tpu.memory_space<vmem>>, %arg10: memref<16x128xf32, #tpu.memory_space<vmem>>) attributes {dimension_semantics = [#tpu.dimension_semantics<parallel>], iteration_bounds = array<i64: 1>, scalar_prefetch = 0 : i64, scratch_operands = 0 : i64, tpu.core_type = #tpu.core_type<tc>, window_params = [{transform_indices = @transform_0, window_bounds = array<i64: 16, 32>}, {pipeline_mode = #tpu.pipeline_mode<synchronous>, transform_indices = @transform_1, window_bounds = array<i64: 32, 1024>}, {pipeline_mode = #tpu.pipeline_mode<synchronous>, transform_indices = @transform_2, window_bounds = array<i64: 1, 1024>}, {pipeline_mode = #tpu.pipeline_mode<synchronous>, transform_indices = @transform_3, window_bounds = array<i64: 1024, 512>}, {pipeline_mode = #tpu.pipeline_mode<synchronous>, transform_indices = @transform_4, window_bounds = array<i64: 1, 512>}, {pipeline_mode = #tpu.pipeline_mode<synchronous>, transform_indices = @transform_5, window_bounds = array<i64: 512, 256>}, {pipeline_mode = #tpu.pipeline_mode<synchronous>, transform_indices = @transform_6, window_bounds = array<i64: 1, 256>}, {pipeline_mode = #tpu.pipeline_mode<synchronous>, transform_indices = @transform_7, window_bounds = array<i64: 256, 128>}, {pipeline_mode = #tpu.pipeline_mode<synchronous>, transform_indices = @transform_8, window_bounds = array<i64: 1, 128>}, {transform_indices = @transform_9, window_bounds = array<i64: 16, 128>}]} {
    %c0 = arith.constant 0 : index
    %c0_0 = arith.constant 0 : index
    %0 = vector.load %arg1[%c0, %c0_0] : memref<16x32xf32, #tpu.memory_space<vmem>>, vector<16x32xf32>
    %1 = arith.truncf %0 : vector<16x32xf32> to vector<16x32xbf16>
    %c0_1 = arith.constant 0 : index
    %c0_2 = arith.constant 0 : index
    %2 = vector.load %arg2[%c0_1, %c0_2] : memref<32x1024xbf16, #tpu.memory_space<vmem>>, vector<32x1024xbf16>
    %cst = arith.constant dense<0.000000e+00> : vector<16x1024xf32>
    %3 = tpu.matmul %1, %2, %cst {dimension_numbers = #tpu.dot_dimension_numbers<[1], [0], [0], [1], [0, 0, 1, 1], [], []>} : vector<16x32xbf16>, vector<32x1024xbf16>, vector<16x1024xf32> -> vector<16x1024xf32>
    %c0_3 = arith.constant 0 : index
    %c0_4 = arith.constant 0 : index
    %4 = vector.load %arg3[%c0_3, %c0_4] : memref<1x1024xf32, #tpu.memory_space<vmem>>, vector<1x1024xf32>
    %5 = vector.broadcast %4 : vector<1x1024xf32> to vector<16x1024xf32>
    %6 = arith.addf %3, %5 : vector<16x1024xf32>
    %cst_5 = arith.constant 0.00999999977 : f32
    %7 = vector.broadcast %cst_5 : f32 to vector<16x1024xf32>
    %8 = arith.mulf %7, %6 : vector<16x1024xf32>
    %9 = arith.maximumf %6, %8 : vector<16x1024xf32>
    %10 = arith.truncf %9 : vector<16x1024xf32> to vector<16x1024xbf16>
    %c0_6 = arith.constant 0 : index
    %c0_7 = arith.constant 0 : index
    %11 = vector.load %arg4[%c0_6, %c0_7] : memref<1024x512xbf16, #tpu.memory_space<vmem>>, vector<1024x512xbf16>
    %cst_8 = arith.constant dense<0.000000e+00> : vector<16x512xf32>
    %12 = tpu.matmul %10, %11, %cst_8 {dimension_numbers = #tpu.dot_dimension_numbers<[1], [0], [0], [1], [0, 0, 1, 1], [], []>} : vector<16x1024xbf16>, vector<1024x512xbf16>, vector<16x512xf32> -> vector<16x512xf32>
    %c0_9 = arith.constant 0 : index
    %c0_10 = arith.constant 0 : index
    %13 = vector.load %arg5[%c0_9, %c0_10] : memref<1x512xf32, #tpu.memory_space<vmem>>, vector<1x512xf32>
    %14 = vector.broadcast %13 : vector<1x512xf32> to vector<16x512xf32>
    %15 = arith.addf %12, %14 : vector<16x512xf32>
    %cst_11 = arith.constant 0.00999999977 : f32
    %16 = vector.broadcast %cst_11 : f32 to vector<16x512xf32>
    %17 = arith.mulf %16, %15 : vector<16x512xf32>
    %18 = arith.maximumf %15, %17 : vector<16x512xf32>
    %19 = arith.truncf %18 : vector<16x512xf32> to vector<16x512xbf16>
    %c0_12 = arith.constant 0 : index
    %c0_13 = arith.constant 0 : index
    %20 = vector.load %arg6[%c0_12, %c0_13] : memref<512x256xbf16, #tpu.memory_space<vmem>>, vector<512x256xbf16>
    %cst_14 = arith.constant dense<0.000000e+00> : vector<16x256xf32>
    %21 = tpu.matmul %19, %20, %cst_14 {dimension_numbers = #tpu.dot_dimension_numbers<[1], [0], [0], [1], [0, 0, 1, 1], [], []>} : vector<16x512xbf16>, vector<512x256xbf16>, vector<16x256xf32> -> vector<16x256xf32>
    %c0_15 = arith.constant 0 : index
    %c0_16 = arith.constant 0 : index
    %22 = vector.load %arg7[%c0_15, %c0_16] : memref<1x256xf32, #tpu.memory_space<vmem>>, vector<1x256xf32>
    %23 = vector.broadcast %22 : vector<1x256xf32> to vector<16x256xf32>
    %24 = arith.addf %21, %23 : vector<16x256xf32>
    %cst_17 = arith.constant 0.00999999977 : f32
    %25 = vector.broadcast %cst_17 : f32 to vector<16x256xf32>
    %26 = arith.mulf %25, %24 : vector<16x256xf32>
    %27 = arith.maximumf %24, %26 : vector<16x256xf32>
    %28 = arith.truncf %27 : vector<16x256xf32> to vector<16x256xbf16>
    %c0_18 = arith.constant 0 : index
    %c0_19 = arith.constant 0 : index
    %29 = vector.load %arg8[%c0_18, %c0_19] : memref<256x128xbf16, #tpu.memory_space<vmem>>, vector<256x128xbf16>
    %cst_20 = arith.constant dense<0.000000e+00> : vector<16x128xf32>
    %30 = tpu.matmul %28, %29, %cst_20 {dimension_numbers = #tpu.dot_dimension_numbers<[1], [0], [0], [1], [0, 0, 1, 1], [], []>} : vector<16x256xbf16>, vector<256x128xbf16>, vector<16x128xf32> -> vector<16x128xf32>
    %c0_21 = arith.constant 0 : index
    %c0_22 = arith.constant 0 : index
    %31 = vector.load %arg9[%c0_21, %c0_22] : memref<1x128xf32, #tpu.memory_space<vmem>>, vector<1x128xf32>
    %32 = vector.broadcast %31 : vector<1x128xf32> to vector<16x128xf32>
    %33 = arith.addf %30, %32 : vector<16x128xf32>
    %c0_23 = arith.constant 0 : index
    %c0_24 = arith.constant 0 : index
    %34 = vector.load %arg10[%c0_23, %c0_24] : memref<16x128xf32, #tpu.memory_space<vmem>>, vector<16x128xf32>
    tpu.vector_store %arg10[%c0_23, %c0_24], %33 {strides = array<i32>} : memref<16x128xf32, #tpu.memory_space<vmem>>, vector<16x128xf32>,
    return
  }
  func.func @transform_0(%arg0: i32) -> (i32, i32) {
    %c0_i32 = arith.constant 0 : i32
    %c0_i32_0 = arith.constant 0 : i32
    return %arg0, %c0_i32 : i32, i32
  }
  func.func @transform_1(%arg0: i32) -> (i32, i32) {
    %c0_i32 = arith.constant 0 : i32
    %c0_i32_0 = arith.constant 0 : i32
    %c0_i32_1 = arith.constant 0 : i32
    return %c0_i32, %c0_i32_0 : i32, i32
  }
  func.func @transform_2(%arg0: i32) -> (i32, i32) {
    %c0_i32 = arith.constant 0 : i32
    %c0_i32_0 = arith.constant 0 : i32
    %c0_i32_1 = arith.constant 0 : i32
    return %c0_i32, %c0_i32_0 : i32, i32
  }
  func.func @transform_3(%arg0: i32) -> (i32, i32) {
    %c0_i32 = arith.constant 0 : i32
    %c0_i32_0 = arith.constant 0 : i32
    %c0_i32_1 = arith.constant 0 : i32
    return %c0_i32, %c0_i32_0 : i32, i32
  }
  func.func @transform_4(%arg0: i32) -> (i32, i32) {
    %c0_i32 = arith.constant 0 : i32
    %c0_i32_0 = arith.constant 0 : i32
    %c0_i32_1 = arith.constant 0 : i32
    return %c0_i32, %c0_i32_0 : i32, i32
  }
  func.func @transform_5(%arg0: i32) -> (i32, i32) {
    %c0_i32 = arith.constant 0 : i32
    %c0_i32_0 = arith.constant 0 : i32
    %c0_i32_1 = arith.constant 0 : i32
    return %c0_i32, %c0_i32_0 : i32, i32
  }
  func.func @transform_6(%arg0: i32) -> (i32, i32) {
    %c0_i32 = arith.constant 0 : i32
    %c0_i32_0 = arith.constant 0 : i32
    %c0_i32_1 = arith.constant 0 : i32
    return %c0_i32, %c0_i32_0 : i32, i32
  }
  func.func @transform_7(%arg0: i32) -> (i32, i32) {
    %c0_i32 = arith.constant 0 : i32
    %c0_i32_0 = arith.constant 0 : i32
    %c0_i32_1 = arith.constant 0 : i32
    return %c0_i32, %c0_i32_0 : i32, i32
  }
  func.func @transform_8(%arg0: i32) -> (i32, i32) {
    %c0_i32 = arith.constant 0 : i32
    %c0_i32_0 = arith.constant 0 : i32
    %c0_i32_1 = arith.constant 0 : i32
    return %c0_i32, %c0_i32_0 : i32, i32
  }
  func.func @transform_9(%arg0: i32) -> (i32, i32) {
    %c0_i32 = arith.constant 0 : i32
    %c0_i32_0 = arith.constant 0 : i32
    return %arg0, %c0_i32 : i32, i32
  }
}

</mosaic_0001>

<bundles_post_ra>
// kernel: tpu_custom_call.1
= control target key start
LH: loop header
LB: loop body
LE: loop exit
PB: predicated region body
PF: predicated region fallthrough
CT: control target
= control target key end

     0   :  { %14 = vsyncpa [#allocation3], 0  ;;  %s4331_s0 = inlined_call_operand.hbm [shape: f32[16,32], index: 0, kind: input, shape index: {}]   ;;  %s4332_s1 = inlined_call_operand.hbm [shape: bf16[32,1024], index: 1, kind: input, shape index: {}]   ;;  %s4333_s2 = inlined_call_operand.hbm [shape: f32[1,1024], index: 2, kind: input, shape index: {}]   ;;  %s4334_s3 = inlined_call_operand.hbm [shape: bf16[1024,512], index: 3, kind: input, shape index: {}]   ;;  %s4335_s4 = inlined_call_operand.vmem [shape: f32[1,512], index: 4, kind: input, shape index: {}]   ;;  %s4336_s5 = inlined_call_operand.hbm [shape: bf16[512,256], index: 5, kind: input, shape index: {}]   ;;  %s4337_s6 = inlined_call_operand.vmem [shape: f32[1,256], index: 6, kind: input, shape index: {}]   ;;  %s4338_s7 = inlined_call_operand.hbm [shape: bf16[256,128], index: 7, kind: input, shape index: {}]   ;;  %s4339_s8 = inlined_call_operand.vmem [shape: f32[1,128], index: 8, kind: input, shape index: {}]   ;;  %s4340_s9 = inlined_call_operand.hbm [shape: f32[16,128], index: 9, kind: output, shape index: {}]  }
   0x1   :  { %15 = vsyncpa [#allocation6], 0 }
   0x2   :  { %16 = vsyncpa [#allocation9], 0 }
   0x3   :  { %17 = vsyncpa [#allocation12], 0 }
   0x4   :  { %18 = vsyncpa [#allocation4], 0  ;;  %s4124_s30 = smov [#allocation5]  }
   0x5   :  { %s36_s10 = sshll.u32 %s4124_s30, 4  ;;  %s37_s10 = int_to_ptr.vmem [resolvable:$true] %s36_s10 }
   0x6   :  { %s3982_s11 = scalar_lea.vmem %s37_s10, 2048  ;;  %p3987_p1 = scmp.lt.s32.totalorder %s37_s10, %s37_s10 }
   0x7   :  { %p3983_p0 = scmp.ne.s32.totalorder %s37_s10, %s3982_s11  ;;  %p3988_p2 = scmp.lt.s32.totalorder %s3982_s11, %s3982_s11 }
   0x9   :  { %p3989_p3 = por %p3988_p2, %p3987_p1 }
   0xb   :  { %p3990_p4 = pnand %p3989_p3, %p3983_p0 }
   0xd   :  { %3993 = shalt.err (!%p3990_p4)
}
   0xe   :  { %s4125_s12 = smov 512   ;;  %s4126_s13 = smov 32  }
   0xf   :  { %42 = dma.hbm_to_vmem [thread:$0]  %s4332_s1, 2048, %s37_s10, [#allocation6], %s4125_s12, %s4125_s12, %s4126_s13  }
  0x10   :  { %s4127_s16 = smov [#allocation8]  }
  0x11   :  { %s58_s17 = sshll.u32 %s4127_s16, 4  ;;  %s59_s17 = int_to_ptr.vmem [resolvable:$true] %s58_s17 }
  0x12   :  { %s4002_s18 = scalar_lea.vmem %s59_s17, 32768  ;;  %p4007_p6 = scmp.lt.s32.totalorder %s59_s17, %s59_s17 }
  0x13   :  { %p4003_p5 = scmp.ne.s32.totalorder %s59_s17, %s4002_s18  ;;  %p4008_p7 = scmp.lt.s32.totalorder %s4002_s18, %s4002_s18 }
  0x15   :  { %p4009_p8 = por %p4008_p7, %p4007_p6 }
  0x17   :  { %p4010_p9 = pnand %p4009_p8, %p4003_p5 }
  0x19   :  { %4013 = shalt.err (!%p4010_p9)
}
  0x1a   :  { %s4128_s19 = smov 256   ;;  %s4129_s20 = smov 16  }
  0x1b   :  { %64 = dma.hbm_to_vmem [thread:$0]  %s4334_s3, 32768, %s59_s17, [#allocation9], %s4128_s19, %s4128_s19, %s4129_s20  }
  0x1c   :  { %s4130_s23 = smov [#allocation2]  }
  0x1d   :  { %s24_s24 = sshll.u32 %s4130_s23, 4  ;;  %s25_s24 = int_to_ptr.vmem [resolvable:$true] %s24_s24 }
  0x1e   :  { %s4022_s1 = scalar_lea.vmem %s25_s24, 256  ;;  %p4027_p11 = scmp.lt.s32.totalorder %s25_s24, %s25_s24 }
  0x1f   :  { %p4023_p10 = scmp.ne.s32.totalorder %s25_s24, %s4022_s1  ;;  %p4028_p12 = scmp.lt.s32.totalorder %s4022_s1, %s4022_s1 }
  0x21   :  { %p4029_p13 = por %p4028_p12, %p4027_p11 }
  0x23   :  { %p4030_p0 = pnand %p4029_p13, %p4023_p10 }
  0x25   :  { %4033 = shalt.err (!%p4030_p0)
}
  0x26   :  { %s4131_s25 = smov 128   ;;  %s4132_s26 = smov 8  }
  0x27   :  { %30 = dma.hbm_to_vmem [thread:$0]  %s4331_s0, 256, %s25_s24, [#allocation3], %s4131_s25, %s4131_s25, %s4132_s26  }
  0x28   :  { %s4133_s3 = smov [#allocation7]   ;;  %s4134_s30 = smov [#allocation10]  }
  0x29   :  { %s49_s29 = sshll.u32 %s4133_s3, 4  ;;  %s72_s10 = sshll.u32 %s4134_s30, 4  ;;  %s50_s29 = int_to_ptr.vmem [resolvable:$true] %s49_s29  ;;  %s73_s10 = int_to_ptr.vmem [resolvable:$true] %s72_s10 }
  0x2a   :  { %s4042_s11 = scalar_lea.vmem %s50_s29, 128  ;;  %p4047_p2 = scmp.lt.s32.totalorder %s50_s29, %s50_s29 }
  0x2b   :  { %p4043_p1 = scmp.ne.s32.totalorder %s50_s29, %s4042_s11  ;;  %p4048_p3 = scmp.lt.s32.totalorder %s4042_s11, %s4042_s11 }
  0x2d   :  { %p4049_p4 = por %p4048_p3, %p4047_p2 }
  0x2f   :  { %p4050_p5 = pnand %p4049_p4, %p4043_p1 }
  0x31   :  { %4053 = shalt.err (!%p4050_p5)
}
  0x32   :  { %52 = dma.hbm_to_vmem [thread:$0]  %s4333_s2, 128, %s50_s29, [#allocation6]  }
  0x33   :  { %s4062_s14 = scalar_lea.vmem %s73_s10, 8192  ;;  %p4067_p7 = scmp.lt.s32.totalorder %s73_s10, %s73_s10 }
  0x34   :  { %p4063_p6 = scmp.ne.s32.totalorder %s73_s10, %s4062_s14  ;;  %p4068_p8 = scmp.lt.s32.totalorder %s4062_s14, %s4062_s14 }
  0x36   :  { %p4069_p9 = por %p4068_p8, %p4067_p7 }
  0x38   :  { %p4070_p10 = pnand %p4069_p9, %p4063_p6 }
  0x3a   :  { %4073 = shalt.err (!%p4070_p10)
}
  0x3b   :  { %78 = dma.hbm_to_vmem [thread:$0]  %s4336_s5, 8192, %s73_s10, [#allocation9], %s4131_s25, %s4131_s25, %s4132_s26  }
  0x3c   :  { %s4135_s16 = smov [#allocation11]  }
  0x3d   :  { %s86_s17 = sshll.u32 %s4135_s16, 4  ;;  %s87_s17 = int_to_ptr.vmem [resolvable:$true] %s86_s17 }
  0x3e   :  { %s4082_s18 = scalar_lea.vmem %s87_s17, 2048  ;;  %p4087_p12 = scmp.lt.s32.totalorder %s87_s17, %s87_s17 }
  0x3f   :  { %p4083_p11 = scmp.ne.s32.totalorder %s87_s17, %s4082_s18  ;;  %p4088_p13 = scmp.lt.s32.totalorder %s4082_s18, %s4082_s18 }
  0x41   :  { %p4089_p0 = por %p4088_p13, %p4087_p12 }
  0x43   :  { %p4090_p1 = pnand %p4089_p0, %p4083_p11 }
  0x45   :  { %4093 = shalt.err (!%p4090_p1)
}
  0x46   :  { %s4136_s2 = smov 64   ;;  %s4137_s19 = smov 4  }
  0x47   :  { %92 = dma.hbm_to_vmem [thread:$0]  %s4338_s7, 2048, %s87_s17, [#allocation12], %s4136_s2, %s4136_s2, %s4137_s19  }
  0x48   :  { %4114 = dma.done.wait [#allocation3], 256  }
  0x49   :  { %4115 = vsyncadd [#allocation3], 4294967040 }
  0x4a   :  { %4116 = dma.done.wait [#allocation6], 2176  }
  0x4b   :  { %4117 = vsyncadd [#allocation6], 4294965120 }
  0x4c   :  { %4118 = dma.done.wait [#allocation9], 40960  }
  0x4d   :  { %4119 = vsyncadd [#allocation9], 4294926336 }
  0x4e   :  { %4120 = dma.done.wait [#allocation12], 2048  }
  0x4f   :  { %4121 = vsyncadd [#allocation12], 4294965248  ;;  %v4138_v0 = vmov 0   ;;  %v125_v1 = vld [vmem:[#allocation5 + $0x40] sm:$0xff]  ;;  %v126_v8 = vld [vmem:[#allocation5 + $0x48] sm:$0xff]  ;;  %vm255_vm0 = vcmask 261120  }
  0x50   :  { %291 = vmatprep.mubr.bf16.mxu1 %v4138_v0  ;;  %v129_v2 = vld [vmem:[#allocation5 + $0x60] sm:$0xff]  ;;  %v130_v9 = vld [vmem:[#allocation5 + $0x68] sm:$0xff]  ;;  %v114_v11 = vld [vmem:[#allocation2] sm:$0xff]  ;;  %s4139_s24 = smov [#allocation13]  }
  0x51   :  { %v117_v3 = vld [vmem:[#allocation5] sm:$0xff]  ;;  %v3092_v4 = vcombine.high %v125_v1, %v129_v2  ;;  %v3091_v5 = vcombine.low %v125_v1, %v129_v2  ;;  %v115_v12 = vld [vmem:[#allocation2 + $0x8] sm:$0xff]  ;;  %v3094_v13 = vcombine.high %v126_v8, %v130_v9  ;;  %v118_v14 = vld [vmem:[#allocation5 + $0x8] sm:$0xff]  ;;  %v3093_v19 = vcombine.low %v126_v8, %v130_v9  ;;  %s3068_s1 = sshll.u32 %s4139_s24, 4  ;;  %s3069_s1 = int_to_ptr.vmem [resolvable:$true] %s3068_s1 }
  0x52   :  { %v121_v6 = vld [vmem:[#allocation5 + $0x20] sm:$0xff]  ;;  %v122_v15 = vld [vmem:[#allocation5 + $0x28] sm:$0xff]  ;;  %v4215_v17 = vpack.c.bf16 %v115_v12, %v114_v11  ;;  %v127_v20 = vld [vmem:[#allocation5 + $0x50] sm:$0xff]  ;;  %s4094_s27 = scalar_lea.vmem %s3069_s1, 256  ;;  %p4099_p3 = scmp.lt.s32.totalorder %s3069_s1, %s3069_s1 }
  0x53   :  { %v3084_v7 = vcombine.high %v117_v3, %v121_v6  ;;  %271 = vmatprep.subr.bf16.mxu1 %v3092_v4  ;;  %v3083_v10 = vcombine.low %v117_v3, %v121_v6  ;;  %v3478_v16 = vld [vmem:[#allocation8 + $0xe4] ss:$16 sps:$4 sm:$0xff]   ;;  %v3480_v18 = vld [vmem:[#allocation8 + $0xe0] ss:$16 sps:$4 sm:$0xff]   ;;  %v3086_v22 = vcombine.high %v118_v14, %v122_v15  ;;  %v131_v24 = vld [vmem:[#allocation5 + $0x70] sm:$0xff]  ;;  %v3085_v26 = vcombine.low %v118_v14, %v122_v15  ;;  %p4095_p2 = scmp.ne.s32.totalorder %s3069_s1, %s4094_s27  ;;  %p4100_p4 = scmp.lt.s32.totalorder %s4094_s27, %s4094_s27 }
  0x54   :  { %272 = vmatpush1.bf16.msra.mxu1 %v3091_v5  ;;  %2029 = vmatprep.subr.bf16.mxu0 %v3478_v16  ;;  %v3481_v21 = vld [vmem:[#allocation8 + $0xc4] ss:$16 sps:$4 sm:$0xff]   ;;  %v3483_v23 = vld [vmem:[#allocation8 + $0xc0] ss:$16 sps:$4 sm:$0xff]   ;;  %v3096_v27 = vcombine.high %v127_v20, %v131_v24  ;;  %v119_v28 = vld [vmem:[#allocation5 + $0x10] sm:$0xff]  ;;  %v3095_v32 = vcombine.low %v127_v20, %v131_v24 }
  0x55   :  { %273 = vmatprep.subr.bf16.mxu1 %v3084_v7  ;;  %2030 = vmatpush1.bf16.msra.mxu0 %v3480_v18  ;;  %v3484_v25 = vld [vmem:[#allocation8 + $0xa4] ss:$16 sps:$4 sm:$0xff]   ;;  %v123_v29 = vld [vmem:[#allocation5 + $0x30] sm:$0xff]  ;;  %v3489_v30 = vld [vmem:[#allocation8 + $0xa0] ss:$16 sps:$4 sm:$0xff]   ;;  %p4101_p5 = por %p4100_p4, %p4099_p3 }
  0x56   :  { %2031 = vmatprep.subr.bf16.mxu0 %v3481_v21  ;;  %v3490_v31 = vld [vmem:[#allocation8 + $0x84] ss:$16 sps:$4 sm:$0xff]   ;;  %v3088_v34 = vcombine.high %v119_v28, %v123_v29  ;;  %v3495_v35 = vld [vmem:[#allocation8 + $0x80] ss:$16 sps:$4 sm:$0xff]   ;;  %v3087_v38 = vcombine.low %v119_v28, %v123_v29 }
  0x57   :  { %v128_v33 = vld [vmem:[#allocation5 + $0x58] sm:$0xff]  ;;  %p4102_p6 = pnand %p4101_p5, %p4095_p2 }
  0x58   :  { %274 = vmatpush1.bf16.msra.mxu1 %v3083_v10  ;;  %v132_v36 = vld [vmem:[#allocation5 + $0x78] sm:$0xff] }
  0x59   :  { %314 = vmatprep.subr.bf16.mxu1 %v3094_v13  ;;  %2032 = vmatpush1.bf16.msra.mxu0 %v3483_v23  ;;  %v3496_v37 = vld [vmem:[#allocation8 + $0x64] ss:$16 sps:$4 sm:$0xff]   ;;  %v3098_v39 = vcombine.high %v128_v33, %v132_v36  ;;  %v3501_v42 = vld [vmem:[#allocation8 + $0x60] ss:$16 sps:$4 sm:$0xff]   ;;  %v3097_v44 = vcombine.low %v128_v33, %v132_v36 }
  0x5a   :  { %2033 = vmatprep.subr.bf16.mxu0 %v3484_v25  ;;  %v120_v40 = vld [vmem:[#allocation5 + $0x18] sm:$0xff] }
  0x5b   :  { %3099 = vmatmul.mubr.msk.bf16.vlgmr.msra.gmra.mxu1 %vm255_vm0, %v4215_v17  ;;  %v124_v41 = vld [vmem:[#allocation5 + $0x38] sm:$0xff] }
  0x5c   :  { %315 = vmatpush1.bf16.msra.mxu1 %v3093_v19  ;;  %334 = vmatprep.mubr.bf16.mxu1 %v4138_v0  ;;  %v3502_v43 = vld [vmem:[#allocation8 + $0x44] ss:$16 sps:$4 sm:$0xff]   ;;  %v3090_v45 = vcombine.high %v120_v40, %v124_v41  ;;  %v3507_v46 = vld [vmem:[#allocation8 + $0x40] ss:$16 sps:$4 sm:$0xff]   ;;  %v3089_v48 = vcombine.low %v120_v40, %v124_v41 }
  0x5d   :  { %316 = vmatprep.subr.bf16.mxu1 %v3086_v22  ;;  %2034 = vmatpush1.bf16.msra.mxu0 %v3489_v30  ;;  %v3508_v47 = vld [vmem:[#allocation8 + $0x24] ss:$16 sps:$4 sm:$0xff]   ;;  %v3513_v50 = vld [vmem:[#allocation8 + $0x20] ss:$16 sps:$4 sm:$0xff]  }
  0x5e   :  { %2035 = vmatprep.subr.bf16.mxu0 %v3490_v31  ;;  %v3488_v49 = vld [vmem:[#allocation8 + $0x2e4] ss:$16 sps:$4 sm:$0xff]   ;;  %v3486_v52 = vld [vmem:[#allocation8 + $0x2e0] ss:$16 sps:$4 sm:$0xff]  }
  0x5f   :  { %v3514_v51 = vld [vmem:[#allocation8 + $0x4] ss:$16 sps:$4 sm:$0xff]   ;;  %v3519_v54 = vld [vmem:[#allocation8] ss:$16 sps:$4 sm:$0xff]  }
  0x60   :  { %317 = vmatpush1.bf16.msra.mxu1 %v3085_v26  ;;  %v3494_v53 = vld [vmem:[#allocation8 + $0x2c4] ss:$16 sps:$4 sm:$0xff]   ;;  %v3492_v56 = vld [vmem:[#allocation8 + $0x2c0] ss:$16 sps:$4 sm:$0xff]  }
  0x61   :  { %357 = vmatprep.subr.bf16.mxu1 %v3096_v27  ;;  %2036 = vmatpush1.bf16.msra.mxu0 %v3495_v35  ;;  %v3520_v55 = vld [vmem:[#allocation8 + $0x1e4] ss:$16 sps:$4 sm:$0xff]   ;;  %v3525_v58 = vld [vmem:[#allocation8 + $0x1e0] ss:$16 sps:$4 sm:$0xff]  }
  0x62   :  { %2037 = vmatprep.subr.bf16.mxu0 %v3496_v37  ;;  %v3500_v57 = vld [vmem:[#allocation8 + $0x2a4] ss:$16 sps:$4 sm:$0xff]   ;;  %v3498_v60 = vld [vmem:[#allocation8 + $0x2a0] ss:$16 sps:$4 sm:$0xff]  }
  0x63   :  { %3100 = vmatmul.mubr.msk.bf16.vlgmr.msra.gmra.mxu1 %vm255_vm0, %v4215_v17  ;;  %v3526_v59 = vld [vmem:[#allocation8 + $0x1c4] ss:$16 sps:$4 sm:$0xff]   ;;  %v3531_v62 = vld [vmem:[#allocation8 + $0x1c0] ss:$16 sps:$4 sm:$0xff]  }
  0x64   :  { %358 = vmatpush1.bf16.msra.mxu1 %v3095_v32  ;;  %377 = vmatprep.mubr.bf16.mxu1 %v4138_v0  ;;  %v3506_v61 = vld [vmem:[#allocation8 + $0x284] ss:$16 sps:$4 sm:$0xff]   ;;  %v3537_v2 = vld [vmem:[#allocation8 + $0x1a0] ss:$16 sps:$4 sm:$0xff]  }
  0x65   :  { %359 = vmatprep.subr.bf16.mxu1 %v3088_v34  ;;  %2038 = vmatpush1.bf16.msra.mxu0 %v3501_v42  ;;  %v3532_v63 = vld [vmem:[#allocation8 + $0x1a4] ss:$16 sps:$4 sm:$0xff]   ;;  %v3510_v4 = vld [vmem:[#allocation8 + $0x260] ss:$16 sps:$4 sm:$0xff]   ;;  %v4236_v42 = vld [vmem:[#allocation7] sm:$0xff] }
  0x66   :  { %2039 = vmatprep.subr.bf16.mxu0 %v3502_v43  ;;  %v3512_v1 = vld [vmem:[#allocation8 + $0x264] ss:$16 sps:$4 sm:$0xff]   ;;  %v3543_v6 = vld [vmem:[#allocation8 + $0x180] ss:$16 sps:$4 sm:$0xff]  }
  0x67   :  { %v3538_v3 = vld [vmem:[#allocation8 + $0x184] ss:$16 sps:$4 sm:$0xff]   ;;  %v3516_v8 = vld [vmem:[#allocation8 + $0x240] ss:$16 sps:$4 sm:$0xff]  }
  0x68   :  { %360 = vmatpush1.bf16.msra.mxu1 %v3087_v38  ;;  %v3518_v5 = vld [vmem:[#allocation8 + $0x244] ss:$16 sps:$4 sm:$0xff]   ;;  %v3522_v10 = vld [vmem:[#allocation8 + $0x220] ss:$16 sps:$4 sm:$0xff]   ;;  %v135_v38 = vlaneseq }
  0x69   :  { %400 = vmatprep.subr.bf16.mxu1 %v3098_v39  ;;  %2040 = vmatpush1.bf16.msra.mxu0 %v3507_v46  ;;  %v3544_v7 = vld [vmem:[#allocation8 + $0x164] ss:$16 sps:$4 sm:$0xff]   ;;  %v3528_v12 = vld [vmem:[#allocation8 + $0x200] ss:$16 sps:$4 sm:$0xff]  }
  0x6a   :  { %2041 = vmatprep.subr.bf16.mxu0 %v3508_v47  ;;  %v3524_v9 = vld [vmem:[#allocation8 + $0x224] ss:$16 sps:$4 sm:$0xff]   ;;  %v3534_v14 = vld [vmem:[#allocation8 + $0x3e0] ss:$16 sps:$4 sm:$0xff]   ;;  %v4228_v39 = vshrl.u32 %v135_v38, 7 }
  0x6b   :  { %3101 = vmatmul.mubr.msk.bf16.vlgmr.msra.gmra.mxu1 %vm255_vm0, %v4215_v17  ;;  %v3530_v11 = vld [vmem:[#allocation8 + $0x204] ss:$16 sps:$4 sm:$0xff]   ;;  %v3540_v16 = vld [vmem:[#allocation8 + $0x3c0] ss:$16 sps:$4 sm:$0xff]  }
  0x6c   :  { %401 = vmatpush1.bf16.msra.mxu1 %v3097_v44  ;;  %420 = vmatprep.mubr.bf16.mxu1 %v4138_v0  ;;  %v3504_v0 = vld [vmem:[#allocation8 + $0x280] ss:$16 sps:$4 sm:$0xff]   ;;  %v3536_v13 = vld [vmem:[#allocation8 + $0x3e4] ss:$16 sps:$4 sm:$0xff]   ;;  %v4231_v40 = vsub.s32 1, %v4228_v39  ;;  %v4234_v41 = vsub.s32 0, %v4228_v39 }
  0x6d   :  { %402 = vmatprep.subr.bf16.mxu1 %v3090_v45  ;;  %2042 = vmatpush1.bf16.msra.mxu0 %v3513_v50  ;;  %v3542_v15 = vld [vmem:[#allocation8 + $0x3c4] ss:$16 sps:$4 sm:$0xff]   ;;  %v3546_v18 = vld [vmem:[#allocation8 + $0x3a0] ss:$16 sps:$4 sm:$0xff]  }
  0x6e   :  { %2043 = vmatprep.subr.bf16.mxu0 %v3514_v51  ;;  %v3549_v19 = vld [vmem:[#allocation8 + $0x160] ss:$16 sps:$4 sm:$0xff]   ;;  %v3550_v20 = vld [vmem:[#allocation8 + $0x144] ss:$16 sps:$4 sm:$0xff]   ;;  %v142_v43 = vrot.slane %v4236_v42, %v4231_v40  ;;  %v138_v44 = vrot.slane %v4236_v42, %v4234_v41  ;;  %v145_v51 = vsub.s32 2, %v4228_v39 }
  0x6f   :  { %v3554_v21 = vld [vmem:[#allocation8 + $0x384] ss:$16 sps:$4 sm:$0xff]   ;;  %v3552_v22 = vld [vmem:[#allocation8 + $0x380] ss:$16 sps:$4 sm:$0xff]  }
  0x70   :  { %403 = vmatpush1.bf16.msra.mxu1 %v3089_v48  ;;  %v3555_v23 = vld [vmem:[#allocation8 + $0x140] ss:$16 sps:$4 sm:$0xff]   ;;  %v3556_v24 = vld [vmem:[#allocation8 + $0x124] ss:$16 sps:$4 sm:$0xff]   ;;  %v149_v48 = vsub.s32 3, %v4228_v39 }
  0x71   :  { %2072 = vmatprep.subr.bf16.mxu1 %v3488_v49  ;;  %2044 = vmatpush1.bf16.msra.mxu0 %v3519_v54  ;;  %v3560_v25 = vld [vmem:[#allocation8 + $0x364] ss:$16 sps:$4 sm:$0xff]   ;;  %v3558_v26 = vld [vmem:[#allocation8 + $0x360] ss:$16 sps:$4 sm:$0xff]  }
  0x72   :  { %2045 = vmatprep.subr.bf16.mxu0 %v3520_v55  ;;  %v3561_v27 = vld [vmem:[#allocation8 + $0x120] ss:$16 sps:$4 sm:$0xff]   ;;  %v3562_v28 = vld [vmem:[#allocation8 + $0x104] ss:$16 sps:$4 sm:$0xff]  }
  0x73   :  { %3102 = vmatmul.mubr.msk.bf16.vlgmr.msra.gmra.mxu1 %vm255_vm0, %v4215_v17  ;;  %v3548_v17 = vld [vmem:[#allocation8 + $0x3a4] ss:$16 sps:$4 sm:$0xff]   ;;  %v3564_v30 = vld [vmem:[#allocation8 + $0x340] ss:$16 sps:$4 sm:$0xff]  }
  0x74   :  { %2073 = vmatpush1.bf16.msra.mxu1 %v3486_v52  ;;  %v3566_v29 = vld [vmem:[#allocation8 + $0x344] ss:$16 sps:$4 sm:$0xff]   ;;  %v3567_v31 = vld [vmem:[#allocation8 + $0x100] ss:$16 sps:$4 sm:$0xff]  }
  0x75   :  { %2074 = vmatprep.subr.bf16.mxu1 %v3494_v53  ;;  %2046 = vmatpush2.bf16.msra.mxu0 %v3525_v58  ;;  %v3570_v32 = vld [vmem:[#allocation8 + $0x324] ss:$16 sps:$4 sm:$0xff]   ;;  %v3568_v34 = vld [vmem:[#allocation8 + $0x320] ss:$16 sps:$4 sm:$0xff]  }
  0x76   :  { %2047 = vmatprep.subr.bf16.mxu0 %v3526_v59  ;;  %v3573_v33 = vld [vmem:[#allocation8 + $0x4e4] ss:$16 sps:$4 sm:$0xff]   ;;  %v3574_v36 = vld [vmem:[#allocation8 + $0x300] ss:$16 sps:$4 sm:$0xff]   ;;  %v146_v59 = vrot.slane %v4236_v42, %v145_v51 }
  0x77   :  { %v3576_v35 = vld [vmem:[#allocation8 + $0x304] ss:$16 sps:$4 sm:$0xff]  }
  0x78   :  { %2075 = vmatpush1.bf16.msra.mxu1 %v3492_v56  ;;  %v3585_v37 = vld [vmem:[#allocation8 + $0x6e4] ss:$16 sps:$4 sm:$0xff]  }
  0x79   :  { %2076 = vmatprep.subr.bf16.mxu1 %v3500_v57  ;;  %2048 = vmatpush2.bf16.msra.mxu0 %v3531_v62  ;;  %v150_v57 = vrot.slane %v4236_v42, %v149_v48 }
  0x7a   :  { %2049 = vmatprep.subr.bf16.mxu0 %v3532_v63 }
  0x7c   :  { %2077 = vmatpush1.bf16.msra.mxu1 %v3498_v60 }
  0x7d   :  { %2078 = vmatprep.subr.bf16.mxu1 %v3506_v61  ;;  %2050 = vmatpush2.bf16.msra.mxu0 %v3537_v2 }
  0x7e   :  { %2051 = vmatprep.subr.bf16.mxu0 %v3538_v3  ;;  %v157_v3 = vsub.s32 5, %v4228_v39 }
  0x80   :  { %2079 = vmatpush1.bf16.msra.mxu1 %v3504_v0 }
  0x81   :  { %2080 = vmatprep.subr.bf16.mxu1 %v3512_v1  ;;  %2052 = vmatpush2.bf16.msra.mxu0 %v3543_v6 }
  0x82   :  { %2053 = vmatprep.subr.bf16.mxu0 %v3544_v7 }
  0x84   :  { %2081 = vmatpush1.bf16.msra.mxu1 %v3510_v4 }
  0x85   :  { %2082 = vmatprep.subr.bf16.mxu1 %v3518_v5  ;;  %2054 = vmatpush2.bf16.msra.mxu0 %v3549_v19 }
  0x86   :  { %2055 = vmatprep.subr.bf16.mxu0 %v3550_v20  ;;  %v3577_v20 = vld [vmem:[#allocation8 + $0x4c0] ss:$16 sps:$4 sm:$0xff]  }
  0x88   :  { %2083 = vmatpush1.bf16.msra.mxu1 %v3516_v8 }
  0x89   :  { %2084 = vmatprep.subr.bf16.mxu1 %v3524_v9  ;;  %2056 = vmatpush2.bf16.msra.mxu0 %v3555_v23  ;;  %v3571_v9 = vld [vmem:[#allocation8 + $0x4e0] ss:$16 sps:$4 sm:$0xff]  }
  0x8a   :  { %2057 = vmatprep.subr.bf16.mxu0 %v3556_v24 }
  0x8c   :  { %2085 = vmatpush1.bf16.msra.mxu1 %v3522_v10 }
  0x8d   :  { %2086 = vmatprep.subr.bf16.mxu1 %v3530_v11  ;;  %2058 = vmatpush2.bf16.msra.mxu0 %v3561_v27  ;;  %v165_v27 = vsub.s32 7, %v4228_v39 }
  0x8e   :  { %2059 = vmatprep.subr.bf16.mxu0 %v3562_v28 }
  0x90   :  { %2087 = vmatpush1.bf16.msra.mxu1 %v3528_v12  ;;  %v3579_v12 = vld [vmem:[#allocation8 + $0x4c4] ss:$16 sps:$4 sm:$0xff]  }
  0x91   :  { %2088 = vmatprep.subr.bf16.mxu1 %v3536_v13  ;;  %2060 = vmatpush2.bf16.msra.mxu0 %v3567_v31  ;;  %v3580_v31 = vld [vmem:[#allocation8 + $0x4a0] ss:$16 sps:$4 sm:$0xff]  }
  0x92   :  { %2115 = vmatprep.subr.bf16.mxu0 %v3573_v33 }
  0x94   :  { %2089 = vmatpush2.bf16.msra.mxu1 %v3534_v14 }
  0x95   :  { %2090 = vmatprep.subr.bf16.mxu1 %v3542_v15 }
  0x98   :  { %2091 = vmatpush2.bf16.msra.mxu1 %v3540_v16  ;;  %v158_v16 = vrot.slane %v4236_v42, %v157_v3 }
  0x99   :  { %2092 = vmatprep.subr.bf16.mxu1 %v3548_v17 }
  0x9c   :  { %2093 = vmatpush2.bf16.msra.mxu1 %v3546_v18 }
  0x9d   :  { %2094 = vmatprep.subr.bf16.mxu1 %v3554_v21 }
  0xa0   :  { %2095 = vmatpush2.bf16.msra.mxu1 %v3552_v22  ;;  %v3582_v22 = vld [vmem:[#allocation8 + $0x4a4] ss:$16 sps:$4 sm:$0xff]  }
  0xa1   :  { %2096 = vmatprep.subr.bf16.mxu1 %v3560_v25 }
  0xa4   :  { %2097 = vmatpush2.bf16.msra.mxu1 %v3558_v26 }
  0xa5   :  { %2098 = vmatprep.subr.bf16.mxu1 %v3566_v29 }
  0xa8   :  { %2099 = vmatpush2.bf16.msra.mxu1 %v3564_v30 }
  0xa9   :  { %2100 = vmatprep.subr.bf16.mxu1 %v3570_v32  ;;  %v3583_v32 = vld [vmem:[#allocation8 + $0x6e0] ss:$16 sps:$4 sm:$0xff]  }
  0xac   :  { %2101 = vmatpush2.bf16.msra.mxu1 %v3568_v34 }
  0xad   :  { %2102 = vmatprep.subr.bf16.mxu1 %v3576_v35  ;;  %v3588_v35 = vld [vmem:[#allocation8 + $0x484] ss:$16 sps:$4 sm:$0xff]  }
  0xb0   :  { %2103 = vmatpush2.bf16.msra.mxu1 %v3574_v36  ;;  %v3591_v36 = vld [vmem:[#allocation8 + $0x6c4] ss:$16 sps:$4 sm:$0xff]  }
  0xb1   :  { %2158 = vmatprep.subr.bf16.mxu1 %v3585_v37 }
 0x11b   :  { %v293_v45 = vpop.f32.mrf.mxu1 }
 0x11c   :  { %v294_v49 = vadd.f32 %v293_v45, %v138_v44  ;;  %v3586_v45 = vld [vmem:[#allocation8 + $0x480] ss:$16 sps:$4 sm:$0xff]  }
 0x11d   :  { %v295_v46 = vpop.f32.mrf.mxu1 }
 0x11e   :  { %v296_v47 = vadd.f32 %v295_v46, %v142_v43  ;;  %v431_v58 = vmul.f32 0.01, %v294_v49  ;;  %v3589_v46 = vld [vmem:[#allocation8 + $0x6c0] ss:$16 sps:$4 sm:$0xff]  }
 0x11f   :  { %v297_v50 = vpop.f32.mrf.mxu1 }
 0x120   :  { %v298_v52 = vadd.f32 %v297_v50, %v138_v44  ;;  %v432_v54 = vmul.f32 0.01, %v296_v47  ;;  %v447_v4 = vmax.f32 %v294_v49, %v431_v58  ;;  %v3594_v50 = vld [vmem:[#allocation8 + $0x464] ss:$16 sps:$4 sm:$0xff]   ;;  %v3595_v58 = vld [vmem:[#allocation8 + $0x6a0] ss:$16 sps:$4 sm:$0xff]  }
 0x121   :  { %v299_v53 = vpop.f32.mrf.mxu1 }
 0x122   :  { %v439_v55 = vmul.f32 0.01, %v298_v52  ;;  %v300_v56 = vadd.f32 %v299_v53, %v142_v43  ;;  %v448_v0 = vmax.f32 %v296_v47, %v432_v54  ;;  %v166_v43 = vrot.slane %v4236_v42, %v165_v27  ;;  %v3633_v27 = vld [vmem:[#allocation8 + $0x7e4] ss:$16 sps:$4 sm:$0xff]  }
 0x123   :  { %v336_v60 = vpop.f32.mrf.mxu1 }
 0x124   :  { %v440_v61 = vmul.f32 0.01, %v300_v56  ;;  %v455_v62 = vmax.f32 %v298_v52, %v439_v55  ;;  %v337_v5 = vadd.f32 %v336_v60, %v146_v59  ;;  %v3597_v52 = vld [vmem:[#allocation8 + $0x6a4] ss:$16 sps:$4 sm:$0xff]  }
 0x125   :  { %v338_v63 = vpop.f32.mrf.mxu1 }
 0x126   :  { %v456_v1 = vmax.f32 %v300_v56, %v440_v61  ;;  %v339_v2 = vadd.f32 %v338_v63, %v150_v57  ;;  %v4253_v11 = vpack.c.bf16 %v455_v62, %v447_v4  ;;  %v433_v17 = vmul.f32 0.01, %v337_v5  ;;  %v3600_v61 = vld [vmem:[#allocation8 + $0x444] ss:$16 sps:$4 sm:$0xff]  }
 0x127   :  { %v340_v6 = vpop.f32.mrf.mxu1  ;;  %v3603_v62 = vld [vmem:[#allocation8 + $0x684] ss:$16 sps:$4 sm:$0xff]  }
 0x128   :  { %v341_v7 = vadd.f32 %v340_v6, %v146_v59  ;;  %v4251_v8 = vpack.c.bf16 %v456_v1, %v448_v0  ;;  %v434_v13 = vmul.f32 0.01, %v339_v2  ;;  %v449_v28 = vmax.f32 %v337_v5, %v433_v17  ;;  %v3598_v1 = vld [vmem:[#allocation8 + $0x440] ss:$16 sps:$4 sm:$0xff]   ;;  %v3606_v5 = vld [vmem:[#allocation8 + $0x424] ss:$16 sps:$4 sm:$0xff]  }
 0x129   :  { %v342_v10 = vpop.f32.mrf.mxu1  ;;  %v3609_v6 = vld [vmem:[#allocation8 + $0x664] ss:$16 sps:$4 sm:$0xff]  }
 0x12a   :  { %v441_v14 = vmul.f32 0.01, %v341_v7  ;;  %v343_v15 = vadd.f32 %v342_v10, %v150_v57  ;;  %2061 = vmatprep.mubr.bf16.mxu0 %v4251_v8  ;;  %v450_v24 = vmax.f32 %v339_v2, %v434_v13  ;;  %v3592_v57 = vld [vmem:[#allocation8 + $0x460] ss:$16 sps:$4 sm:$0xff]   ;;  %v3612_v13 = vld [vmem:[#allocation8 + $0x404] ss:$16 sps:$4 sm:$0xff]  }
 0x12b   :  { %2062 = vmatmul.mubr.bf16.vlgmr.msra.gmra.mxu0 %v4253_v11  ;;  %v4258_v18 = vpop.f32.mrf.mxu1  ;;  %v3601_v2 = vld [vmem:[#allocation8 + $0x680] ss:$16 sps:$4 sm:$0xff]   ;;  %v3618_v17 = vld [vmem:[#allocation8 + $0x5e4] ss:$16 sps:$4 sm:$0xff]  }
 0x12c   :  { %v442_v19 = vmul.f32 0.01, %v343_v15  ;;  %2116 = vmatpush1.bf16.msra.mxu0 %v3571_v9  ;;  %v457_v21 = vmax.f32 %v341_v7, %v441_v14  ;;  %v3604_v9 = vld [vmem:[#allocation8 + $0x420] ss:$16 sps:$4 sm:$0xff]   ;;  %v3615_v14 = vld [vmem:[#allocation8 + $0x644] ss:$16 sps:$4 sm:$0xff]  }
 0x12d   :  { %2117 = vmatprep.subr.bf16.mxu0 %v3579_v12  ;;  %v381_v23 = vpop.f32.mrf.mxu1  ;;  %v3607_v10 = vld [vmem:[#allocation8 + $0x660] ss:$16 sps:$4 sm:$0xff]  }
 0x12e   :  { %v458_v25 = vmax.f32 %v343_v15, %v442_v19  ;;  %v382_v26 = vadd.f32 %v381_v23, %v158_v16  ;;  %v4265_v34 = vpack.c.bf16 %v457_v21, %v449_v28  ;;  %v3610_v15 = vld [vmem:[#allocation8 + $0x400] ss:$16 sps:$4 sm:$0xff]   ;;  %v3621_v19 = vld [vmem:[#allocation8 + $0x624] ss:$16 sps:$4 sm:$0xff]  }
 0x12f   :  { %v4261_v29 = vpop.f32.mrf.mxu1  ;;  %v3619_v21 = vld [vmem:[#allocation8 + $0x620] ss:$16 sps:$4 sm:$0xff]   ;;  %v3627_v23 = vld [vmem:[#allocation8 + $0x604] ss:$16 sps:$4 sm:$0xff]  }
 0x130   :  { %2118 = vmatpush1.bf16.msra.mxu0 %v3577_v20  ;;  %v4263_v30 = vpack.c.bf16 %v458_v25, %v450_v24  ;;  %v436_v33 = vmul.f32 0.01, %v382_v26  ;;  %v3616_v20 = vld [vmem:[#allocation8 + $0x5e0] ss:$16 sps:$4 sm:$0xff]  }
 0x131   :  { %2119 = vmatprep.subr.bf16.mxu0 %v3582_v22  ;;  %v385_v37 = vpop.f32.mrf.mxu1  ;;  %v3624_v22 = vld [vmem:[#allocation8 + $0x5c4] ss:$16 sps:$4 sm:$0xff]   ;;  %v3622_v24 = vld [vmem:[#allocation8 + $0x5c0] ss:$16 sps:$4 sm:$0xff]  }
 0x132   :  { %2104 = vmatprep.mubr.bf16.mxu1 %v4263_v30  ;;  %v386_v38 = vadd.f32 %v385_v37, %v158_v16  ;;  %v452_v47 = vmax.f32 %v382_v26, %v436_v33  ;;  %v3613_v16 = vld [vmem:[#allocation8 + $0x640] ss:$16 sps:$4 sm:$0xff]   ;;  %v3630_v26 = vld [vmem:[#allocation8 + $0x5a4] ss:$16 sps:$4 sm:$0xff]  }
 0x133   :  { %2105 = vmatmul.mubr.bf16.vlgmr.msra.gmra.mxu1 %v4265_v34  ;;  %v4270_v44 = vpop.f32.mrf.mxu1  ;;  %v3625_v25 = vld [vmem:[#allocation8 + $0x600] ss:$16 sps:$4 sm:$0xff]   ;;  %v3639_v33 = vld [vmem:[#allocation8 + $0x7c4] ss:$16 sps:$4 sm:$0xff]  }
 0x134   :  { %2120 = vmatpush1.bf16.msra.mxu0 %v3580_v31  ;;  %2159 = vmatpush1.bf16.msra.mxu1 %v3583_v32  ;;  %v444_v49 = vmul.f32 0.01, %v386_v38  ;;  %v3628_v28 = vld [vmem:[#allocation8 + $0x5a0] ss:$16 sps:$4 sm:$0xff]   ;;  %v3636_v32 = vld [vmem:[#allocation8 + $0x584] ss:$16 sps:$4 sm:$0xff]  }
 0x135   :  { %2121 = vmatprep.subr.bf16.mxu0 %v3588_v35  ;;  %2160 = vmatprep.subr.bf16.mxu1 %v3591_v36  ;;  %v424_v53 = vpop.f32.mrf.mxu1  ;;  %v3631_v31 = vld [vmem:[#allocation8 + $0x7e0] ss:$16 sps:$4 sm:$0xff]   ;;  %v153_v35 = vsub.s32 4, %v4228_v39 }
 0x136   :  { %v460_v54 = vmax.f32 %v386_v38, %v444_v49  ;;  %v425_v55 = vadd.f32 %v424_v53, %v166_v43  ;;  %v3634_v36 = vld [vmem:[#allocation8 + $0x580] ss:$16 sps:$4 sm:$0xff]   ;;  %v3642_v38 = vld [vmem:[#allocation8 + $0x564] ss:$16 sps:$4 sm:$0xff]  }
 0x137   :  { %v4272_v56 = vpop.f32.mrf.mxu1  ;;  %v3637_v37 = vld [vmem:[#allocation8 + $0x7c0] ss:$16 sps:$4 sm:$0xff]   ;;  %v3648_v49 = vld [vmem:[#allocation8 + $0x544] ss:$16 sps:$4 sm:$0xff]  }
 0x138   :  { %2122 = vmatpush1.bf16.msra.mxu0 %v3586_v45  ;;  %2161 = vmatpush1.bf16.msra.mxu1 %v3589_v46  ;;  %v438_v59 = vmul.f32 0.01, %v425_v55  ;;  %v4274_v60 = vpack.c.bf16 %v460_v54, %v452_v47  ;;  %v154_v45 = vrot.slane %v4236_v42, %v153_v35  ;;  %v3640_v46 = vld [vmem:[#allocation8 + $0x560] ss:$16 sps:$4 sm:$0xff]   ;;  %v3688_v35 = vld [vmem:[#allocation8 + $0x68] ss:$16 sps:$4 sm:$0xff]  }
 0x139   :  { %2123 = vmatprep.subr.bf16.mxu0 %v3594_v50  ;;  %2162 = vmatprep.subr.bf16.mxu1 %v3597_v52  ;;  %v428_v63 = vpop.f32.mrf.mxu1  ;;  %v3643_v47 = vld [vmem:[#allocation8 + $0x7a0] ss:$16 sps:$4 sm:$0xff]   ;;  %v3651_v50 = vld [vmem:[#allocation8 + $0x784] ss:$16 sps:$4 sm:$0xff]  }
 0x13a   :  { %v429_v0 = vadd.f32 %v428_v63, %v166_v43  ;;  %2147 = vmatprep.mubr.bf16.mxu0 %v4274_v60  ;;  %v454_v3 = vmax.f32 %v425_v55, %v438_v59  ;;  %v3645_v43 = vld [vmem:[#allocation8 + $0x7a4] ss:$16 sps:$4 sm:$0xff]   ;;  %v380_v52 = vadd.f32 %v4258_v18, %v154_v45  ;;  %v3646_v53 = vld [vmem:[#allocation8 + $0x540] ss:$16 sps:$4 sm:$0xff]   ;;  %v384_v55 = vadd.f32 %v4261_v29, %v154_v45  ;;  %v3697_v45 = vld [vmem:[#allocation8 + $0x288] ss:$16 sps:$4 sm:$0xff]  }
 0x13b   :  { %v3649_v54 = vld [vmem:[#allocation8 + $0x780] ss:$16 sps:$4 sm:$0xff]   ;;  %v3657_v59 = vld [vmem:[#allocation8 + $0x764] ss:$16 sps:$4 sm:$0xff]  }
 0x13c   :  { %2124 = vmatpush1.bf16.msra.mxu0 %v3592_v57  ;;  %2163 = vmatpush1.bf16.msra.mxu1 %v3595_v58  ;;  %v446_v4 = vmul.f32 0.01, %v429_v0  ;;  %v161_v57 = vsub.s32 6, %v4228_v39  ;;  %v3654_v58 = vld [vmem:[#allocation8 + $0x524] ss:$16 sps:$4 sm:$0xff]  }
 0x13d   :  { %2125 = vmatprep.subr.bf16.mxu0 %v3600_v61  ;;  %2164 = vmatprep.subr.bf16.mxu1 %v3603_v62  ;;  %v435_v61 = vmul.f32 0.01, %v380_v52  ;;  %v3652_v62 = vld [vmem:[#allocation8 + $0x520] ss:$16 sps:$4 sm:$0xff]  }
 0x13e   :  { %v462_v7 = vmax.f32 %v429_v0, %v446_v4  ;;  %v3655_v63 = vld [vmem:[#allocation8 + $0x760] ss:$16 sps:$4 sm:$0xff]   ;;  %v443_v0 = vmul.f32 0.01, %v384_v55  ;;  %v162_v18 = vrot.slane %v4236_v42, %v161_v57  ;;  %v3717_v57 = vld [vmem:[#allocation8 + $0x22c] ss:$16 sps:$4 sm:$0xff]  }
 0x13f   :  { %v3658_v29 = vld [vmem:[#allocation8 + $0x500] ss:$16 sps:$4 sm:$0xff]  }
 0x140   :  { %2126 = vmatpush1.bf16.msra.mxu0 %v3598_v1  ;;  %2165 = vmatpush1.bf16.msra.mxu1 %v3601_v2  ;;  %v4277_v12 = vpack.c.bf16 %v462_v7, %v454_v3  ;;  %v3660_v1 = vld [vmem:[#allocation8 + $0x504] ss:$16 sps:$4 sm:$0xff]   ;;  %v451_v3 = vmax.f32 %v380_v52, %v435_v61  ;;  %v3661_v4 = vld [vmem:[#allocation8 + $0x740] ss:$16 sps:$4 sm:$0xff]   ;;  %v427_v7 = vadd.f32 %v4272_v56, %v162_v18  ;;  %v3673_v56 = vld [vmem:[#allocation8 + $0xc8] ss:$16 sps:$4 sm:$0xff]  }
 0x141   :  { %2127 = vmatprep.subr.bf16.mxu0 %v3606_v5  ;;  %2166 = vmatprep.subr.bf16.mxu1 %v3609_v6  ;;  %v3663_v2 = vld [vmem:[#allocation8 + $0x744] ss:$16 sps:$4 sm:$0xff]   ;;  %v459_v5 = vmax.f32 %v384_v55, %v443_v0  ;;  %v423_v6 = vadd.f32 %v4270_v44, %v162_v18  ;;  %v3664_v42 = vld [vmem:[#allocation8 + $0x720] ss:$16 sps:$4 sm:$0xff]   ;;  %v3711_v52 = vld [vmem:[#allocation8 + $0x24c] ss:$16 sps:$4 sm:$0xff]  }
 0x142   :  { %2190 = vmatprep.mubr.bf16.mxu1 %v4277_v12  ;;  %v3670_v44 = vld [vmem:[#allocation8 + $0x700] ss:$16 sps:$4 sm:$0xff]   ;;  %v3714_v55 = vld [vmem:[#allocation8 + $0x1ec] ss:$16 sps:$4 sm:$0xff]   ;;  %v3721_v0 = vld [vmem:[#allocation8 + $0x208] ss:$16 sps:$4 sm:$0xff]  }
 0x143   :  { %v3720_v61 = vld [vmem:[#allocation8 + $0x1cc] ss:$16 sps:$4 sm:$0xff]  }
 0x144   :  { %2128 = vmatpush1.bf16.msra.mxu0 %v3604_v9  ;;  %2167 = vmatpush1.bf16.msra.mxu1 %v3607_v10  ;;  %v3666_v9 = vld [vmem:[#allocation8 + $0x724] ss:$16 sps:$4 sm:$0xff]   ;;  %v3669_v10 = vld [vmem:[#allocation8 + $0xec] ss:$16 sps:$4 sm:$0xff]  }
 0x145   :  { %2129 = vmatprep.subr.bf16.mxu0 %v3612_v13  ;;  %2168 = vmatprep.subr.bf16.mxu1 %v3615_v14  ;;  %v3667_v13 = vld [vmem:[#allocation8 + $0xe8] ss:$16 sps:$4 sm:$0xff]   ;;  %v4288_v14 = vpack.c.bf16 %v459_v5, %v451_v3  ;;  %v3726_v18 = vld [vmem:[#allocation8 + $0x1ac] ss:$16 sps:$4 sm:$0xff]  }
 0x146   :  { %v3727_v3 = vld [vmem:[#allocation8 + $0x3e8] ss:$16 sps:$4 sm:$0xff]  }
 0x147   :  { %v3730_v5 = vld [vmem:[#allocation8 + $0x188] ss:$16 sps:$4 sm:$0xff]  }
 0x148   :  { %2130 = vmatpush1.bf16.msra.mxu0 %v3610_v15  ;;  %2169 = vmatpush1.bf16.msra.mxu1 %v3613_v16  ;;  %v437_v15 = vmul.f32 0.01, %v423_v6  ;;  %v445_v16 = vmul.f32 0.01, %v427_v7 }
 0x149   :  { %2131 = vmatprep.subr.bf16.mxu0 %v3618_v17  ;;  %2170 = vmatprep.subr.bf16.mxu1 %v3621_v19  ;;  %v3672_v17 = vld [vmem:[#allocation8 + $0x704] ss:$16 sps:$4 sm:$0xff]   ;;  %v3675_v19 = vld [vmem:[#allocation8 + $0xcc] ss:$16 sps:$4 sm:$0xff]  }
 0x14c   :  { %2132 = vmatpush2.bf16.msra.mxu0 %v3616_v20  ;;  %2171 = vmatpush1.bf16.msra.mxu1 %v3619_v21  ;;  %v453_v20 = vmax.f32 %v423_v6, %v437_v15  ;;  %v461_v21 = vmax.f32 %v427_v7, %v445_v16  ;;  %v3733_v6 = vld [vmem:[#allocation8 + $0x3c8] ss:$16 sps:$4 sm:$0xff]   ;;  %v3738_v7 = vld [vmem:[#allocation8 + $0x16c] ss:$16 sps:$4 sm:$0xff]  }
 0x14d   :  { %2133 = vmatprep.subr.bf16.mxu0 %v3624_v22  ;;  %2172 = vmatprep.subr.bf16.mxu1 %v3627_v23  ;;  %v3678_v22 = vld [vmem:[#allocation8 + $0xac] ss:$16 sps:$4 sm:$0xff]   ;;  %v3742_v16 = vld [vmem:[#allocation8 + $0x148] ss:$16 sps:$4 sm:$0xff]  }
 0x14e   :  { %v3681_v23 = vld [vmem:[#allocation8 + $0x2ec] ss:$16 sps:$4 sm:$0xff]  }
 0x14f   :  { %v3747_v15 = vld [vmem:[#allocation8 + $0x38c] ss:$16 sps:$4 sm:$0xff]  }
 0x150   :  { %2134 = vmatpush2.bf16.msra.mxu0 %v3622_v24  ;;  %2173 = vmatpush1.bf16.msra.mxu1 %v3625_v25  ;;  %v3676_v24 = vld [vmem:[#allocation8 + $0xa8] ss:$16 sps:$4 sm:$0xff]  }
 0x151   :  { %2135 = vmatprep.subr.bf16.mxu0 %v3630_v26  ;;  %2174 = vmatprep.subr.bf16.mxu1 %v3633_v27  ;;  %v3679_v25 = vld [vmem:[#allocation8 + $0x2e8] ss:$16 sps:$4 sm:$0xff]   ;;  %v4292_v26 = vpack.c.bf16 %v461_v21, %v453_v20  ;;  %v3684_v27 = vld [vmem:[#allocation8 + $0x8c] ss:$16 sps:$4 sm:$0xff]  }
 0x152   :  { %v3751_v20 = vld [vmem:[#allocation8 + $0x368] ss:$16 sps:$4 sm:$0xff]   ;;  %v3756_v21 = vld [vmem:[#allocation8 + $0x10c] ss:$16 sps:$4 sm:$0xff]  }
 0x154   :  { %2136 = vmatpush2.bf16.msra.mxu0 %v3628_v28  ;;  %2175 = vmatpush2.bf16.msra.mxu1 %v3631_v31  ;;  %v3687_v28 = vld [vmem:[#allocation8 + $0x2cc] ss:$16 sps:$4 sm:$0xff]   ;;  %v3682_v31 = vld [vmem:[#allocation8 + $0x88] ss:$16 sps:$4 sm:$0xff]  }
 0x155   :  { %2137 = vmatprep.subr.bf16.mxu0 %v3636_v32  ;;  %2176 = vmatprep.subr.bf16.mxu1 %v3639_v33  ;;  %v3690_v32 = vld [vmem:[#allocation8 + $0x6c] ss:$16 sps:$4 sm:$0xff]  }
 0x156   :  { %v3693_v33 = vld [vmem:[#allocation8 + $0x2ac] ss:$16 sps:$4 sm:$0xff]  }
 0x158   :  { %2138 = vmatpush2.bf16.msra.mxu0 %v3634_v36  ;;  %2177 = vmatpush2.bf16.msra.mxu1 %v3637_v37  ;;  %v3691_v36 = vld [vmem:[#allocation8 + $0x2a8] ss:$16 sps:$4 sm:$0xff]   ;;  %v3696_v37 = vld [vmem:[#allocation8 + $0x4c] ss:$16 sps:$4 sm:$0xff]  }
 0x159   :  { %2139 = vmatprep.subr.bf16.mxu0 %v3642_v38  ;;  %2178 = vmatprep.subr.bf16.mxu1 %v3645_v43  ;;  %v3699_v38 = vld [vmem:[#allocation8 + $0x28c] ss:$16 sps:$4 sm:$0xff]   ;;  %v3694_v43 = vld [vmem:[#allocation8 + $0x48] ss:$16 sps:$4 sm:$0xff]  }
 0x15c   :  { %2140 = vmatpush2.bf16.msra.mxu0 %v3640_v46  ;;  %2179 = vmatpush2.bf16.msra.mxu1 %v3643_v47  ;;  %v3702_v46 = vld [vmem:[#allocation8 + $0x2c] ss:$16 sps:$4 sm:$0xff]   ;;  %v3700_v47 = vld [vmem:[#allocation8 + $0x28] ss:$16 sps:$4 sm:$0xff]  }
 0x15d   :  { %2141 = vmatprep.subr.bf16.mxu0 %v3648_v49  ;;  %2180 = vmatprep.subr.bf16.mxu1 %v3651_v50  ;;  %v3703_v49 = vld [vmem:[#allocation8 + $0x268] ss:$16 sps:$4 sm:$0xff]   ;;  %v3708_v50 = vld [vmem:[#allocation8 + $0xc] ss:$16 sps:$4 sm:$0xff]  }
 0x160   :  { %2142 = vmatpush2.bf16.msra.mxu0 %v3646_v53  ;;  %2181 = vmatpush2.bf16.msra.mxu1 %v3649_v54  ;;  %v3706_v53 = vld [vmem:[#allocation8 + $0x8] ss:$16 sps:$4 sm:$0xff]  }
 0x161   :  { %2143 = vmatprep.subr.bf16.mxu0 %v3654_v58  ;;  %2182 = vmatprep.subr.bf16.mxu1 %v3657_v59  ;;  %v3709_v54 = vld [vmem:[#allocation8 + $0x248] ss:$16 sps:$4 sm:$0xff]  }
 0x162   :  { %v3712_v58 = vld [vmem:[#allocation8 + $0x1e8] ss:$16 sps:$4 sm:$0xff]  }
 0x163   :  { %v3715_v59 = vld [vmem:[#allocation8 + $0x228] ss:$16 sps:$4 sm:$0xff]  }
 0x164   :  { %2144 = vmatpush2.bf16.msra.mxu0 %v3652_v62  ;;  %2183 = vmatpush2.bf16.msra.mxu1 %v3655_v63  ;;  %v3723_v62 = vld [vmem:[#allocation8 + $0x20c] ss:$16 sps:$4 sm:$0xff]   ;;  %v3718_v63 = vld [vmem:[#allocation8 + $0x1c8] ss:$16 sps:$4 sm:$0xff]  }
 0x165   :  { %2145 = vmatprep.subr.bf16.mxu0 %v3660_v1  ;;  %2184 = vmatprep.subr.bf16.mxu1 %v3663_v2  ;;  %v3729_v1 = vld [vmem:[#allocation8 + $0x3ec] ss:$16 sps:$4 sm:$0xff]   ;;  %v3724_v2 = vld [vmem:[#allocation8 + $0x1a8] ss:$16 sps:$4 sm:$0xff]  }
 0x168   :  { %2146 = vmatpush2.bf16.msra.mxu0 %v3658_v29  ;;  %2185 = vmatpush2.bf16.msra.mxu1 %v3661_v4  ;;  %v3732_v29 = vld [vmem:[#allocation8 + $0x18c] ss:$16 sps:$4 sm:$0xff]  }
 0x169   :  { %2186 = vmatprep.subr.bf16.mxu1 %v3666_v9  ;;  %2201 = vmatprep.subr.bf16.mxu0 %v3669_v10  ;;  %v3735_v4 = vld [vmem:[#allocation8 + $0x3cc] ss:$16 sps:$4 sm:$0xff]   ;;  %v3736_v10 = vld [vmem:[#allocation8 + $0x168] ss:$16 sps:$4 sm:$0xff]  }
 0x16a   :  { %v3741_v9 = vld [vmem:[#allocation8 + $0x3ac] ss:$16 sps:$4 sm:$0xff]  }
 0x16b   :  { %2148 = vmatmul.mubr.bf16.vlgmr.msra.gmra.mxu0 %v4288_v14 }
 0x16c   :  { %2187 = vmatpush2.bf16.msra.mxu1 %v3664_v42  ;;  %2202 = vmatpush1.bf16.msra.mxu0 %v3667_v13  ;;  %v3739_v42 = vld [vmem:[#allocation8 + $0x3a8] ss:$16 sps:$4 sm:$0xff]   ;;  %v3744_v13 = vld [vmem:[#allocation8 + $0x14c] ss:$16 sps:$4 sm:$0xff]  }
 0x16d   :  { %2233 = vmatprep.mubr.bf16.mxu0 %v4251_v8  ;;  %2188 = vmatprep.subr.bf16.mxu1 %v3672_v17  ;;  %v3685_v8 = vld [vmem:[#allocation8 + $0x2c8] ss:$16 sps:$4 sm:$0xff]  }
 0x16e   :  { %2203 = vmatprep.subr.bf16.mxu0 %v3675_v19  ;;  %v3745_v17 = vld [vmem:[#allocation8 + $0x388] ss:$16 sps:$4 sm:$0xff]   ;;  %v3750_v19 = vld [vmem:[#allocation8 + $0x12c] ss:$16 sps:$4 sm:$0xff]  }
 0x170   :  { %2189 = vmatpush2.bf16.msra.mxu1 %v3670_v44  ;;  %2204 = vmatpush1.bf16.msra.mxu0 %v3673_v56  ;;  %v3753_v44 = vld [vmem:[#allocation8 + $0x36c] ss:$16 sps:$4 sm:$0xff]   ;;  %v3748_v56 = vld [vmem:[#allocation8 + $0x128] ss:$16 sps:$4 sm:$0xff]  }
 0x171   :  { %2205 = vmatprep.subr.bf16.mxu0 %v3678_v22  ;;  %2244 = vmatprep.subr.bf16.mxu1 %v3681_v23  ;;  %v3759_v22 = vld [vmem:[#allocation8 + $0x34c] ss:$16 sps:$4 sm:$0xff]   ;;  %v3754_v23 = vld [vmem:[#allocation8 + $0x108] ss:$16 sps:$4 sm:$0xff]  }
 0x173   :  { %2191 = vmatmul.mubr.bf16.vlgmr.msra.gmra.mxu1 %v4292_v26 }
 0x174   :  { %2206 = vmatpush1.bf16.msra.mxu0 %v3676_v24  ;;  %2245 = vmatpush1.bf16.msra.mxu1 %v3679_v25  ;;  %v3757_v24 = vld [vmem:[#allocation8 + $0x348] ss:$16 sps:$4 sm:$0xff]   ;;  %v3762_v25 = vld [vmem:[#allocation8 + $0x32c] ss:$16 sps:$4 sm:$0xff]  }
 0x175   :  { %2276 = vmatprep.mubr.bf16.mxu1 %v4263_v30  ;;  %2207 = vmatprep.subr.bf16.mxu0 %v3684_v27  ;;  %v3705_v30 = vld [vmem:[#allocation8 + $0x26c] ss:$16 sps:$4 sm:$0xff]  }
 0x176   :  { %2246 = vmatprep.subr.bf16.mxu1 %v3687_v28  ;;  %v3765_v27 = vld [vmem:[#allocation8 + $0x4ec] ss:$16 sps:$4 sm:$0xff]   ;;  %v3760_v28 = vld [vmem:[#allocation8 + $0x328] ss:$16 sps:$4 sm:$0xff]  }
 0x178   :  { %2208 = vmatpush1.bf16.msra.mxu0 %v3682_v31  ;;  %2247 = vmatpush1.bf16.msra.mxu1 %v3685_v8  ;;  %v3763_v31 = vld [vmem:[#allocation8 + $0x4e8] ss:$16 sps:$4 sm:$0xff]   ;;  %v3768_v8 = vld [vmem:[#allocation8 + $0x30c] ss:$16 sps:$4 sm:$0xff]  }
 0x179   :  { %2209 = vmatprep.subr.bf16.mxu0 %v3690_v32  ;;  %2248 = vmatprep.subr.bf16.mxu1 %v3693_v33  ;;  %v3771_v32 = vld [vmem:[#allocation8 + $0x4cc] ss:$16 sps:$4 sm:$0xff]   ;;  %v3766_v33 = vld [vmem:[#allocation8 + $0x308] ss:$16 sps:$4 sm:$0xff]  }
 0x17c   :  { %2210 = vmatpush1.bf16.msra.mxu0 %v3688_v35  ;;  %2249 = vmatpush1.bf16.msra.mxu1 %v3691_v36  ;;  %v3769_v35 = vld [vmem:[#allocation8 + $0x4c8] ss:$16 sps:$4 sm:$0xff]   ;;  %v3774_v36 = vld [vmem:[#allocation8 + $0x4ac] ss:$16 sps:$4 sm:$0xff]  }
 0x17d   :  { %2211 = vmatprep.subr.bf16.mxu0 %v3696_v37  ;;  %2250 = vmatprep.subr.bf16.mxu1 %v3699_v38  ;;  %v3777_v37 = vld [vmem:[#allocation8 + $0x6ec] ss:$16 sps:$4 sm:$0xff]   ;;  %v3772_v38 = vld [vmem:[#allocation8 + $0x4a8] ss:$16 sps:$4 sm:$0xff]  }
 0x180   :  { %2212 = vmatpush1.bf16.msra.mxu0 %v3694_v43  ;;  %2251 = vmatpush1.bf16.msra.mxu1 %v3697_v45  ;;  %v3775_v43 = vld [vmem:[#allocation8 + $0x6e8] ss:$16 sps:$4 sm:$0xff]   ;;  %v3780_v45 = vld [vmem:[#allocation8 + $0x48c] ss:$16 sps:$4 sm:$0xff]  }
 0x181   :  { %2213 = vmatprep.subr.bf16.mxu0 %v3702_v46  ;;  %2252 = vmatprep.subr.bf16.mxu1 %v3705_v30  ;;  %v3783_v46 = vld [vmem:[#allocation8 + $0x6cc] ss:$16 sps:$4 sm:$0xff]   ;;  %v3781_v30 = vld [vmem:[#allocation8 + $0x6c8] ss:$16 sps:$4 sm:$0xff]  }
 0x184   :  { %2214 = vmatpush1.bf16.msra.mxu0 %v3700_v47  ;;  %2253 = vmatpush1.bf16.msra.mxu1 %v3703_v49  ;;  %v3789_v47 = vld [vmem:[#allocation8 + $0x6ac] ss:$16 sps:$4 sm:$0xff]   ;;  %v3784_v49 = vld [vmem:[#allocation8 + $0x468] ss:$16 sps:$4 sm:$0xff]  }
 0x185   :  { %2215 = vmatprep.subr.bf16.mxu0 %v3708_v50  ;;  %2254 = vmatprep.subr.bf16.mxu1 %v3711_v52  ;;  %v3787_v50 = vld [vmem:[#allocation8 + $0x6a8] ss:$16 sps:$4 sm:$0xff]   ;;  %v3792_v52 = vld [vmem:[#allocation8 + $0x44c] ss:$16 sps:$4 sm:$0xff]  }
 0x188   :  { %2216 = vmatpush1.bf16.msra.mxu0 %v3706_v53  ;;  %2255 = vmatpush1.bf16.msra.mxu1 %v3709_v54  ;;  %v3795_v53 = vld [vmem:[#allocation8 + $0x68c] ss:$16 sps:$4 sm:$0xff]   ;;  %v3793_v54 = vld [vmem:[#allocation8 + $0x688] ss:$16 sps:$4 sm:$0xff]  }
 0x189   :  { %2217 = vmatprep.subr.bf16.mxu0 %v3714_v55  ;;  %2256 = vmatprep.subr.bf16.mxu1 %v3717_v57  ;;  %v3798_v55 = vld [vmem:[#allocation8 + $0x42c] ss:$16 sps:$4 sm:$0xff]   ;;  %v3796_v57 = vld [vmem:[#allocation8 + $0x428] ss:$16 sps:$4 sm:$0xff]  }
 0x18c   :  { %2218 = vmatpush2.bf16.msra.mxu0 %v3712_v58  ;;  %2257 = vmatpush1.bf16.msra.mxu1 %v3715_v59  ;;  %v3799_v58 = vld [vmem:[#allocation8 + $0x668] ss:$16 sps:$4 sm:$0xff]   ;;  %v3804_v59 = vld [vmem:[#allocation8 + $0x40c] ss:$16 sps:$4 sm:$0xff]  }
 0x18d   :  { %2219 = vmatprep.subr.bf16.mxu0 %v3720_v61  ;;  %2258 = vmatprep.subr.bf16.mxu1 %v3723_v62  ;;  %v3807_v61 = vld [vmem:[#allocation8 + $0x64c] ss:$16 sps:$4 sm:$0xff]   ;;  %v3802_v62 = vld [vmem:[#allocation8 + $0x408] ss:$16 sps:$4 sm:$0xff]  }
 0x190   :  { %2220 = vmatpush2.bf16.msra.mxu0 %v3718_v63  ;;  %2259 = vmatpush1.bf16.msra.mxu1 %v3721_v0  ;;  %v3805_v63 = vld [vmem:[#allocation8 + $0x648] ss:$16 sps:$4 sm:$0xff]   ;;  %v3810_v0 = vld [vmem:[#allocation8 + $0x5ec] ss:$16 sps:$4 sm:$0xff]  }
 0x191   :  { %2221 = vmatprep.subr.bf16.mxu0 %v3726_v18  ;;  %2260 = vmatprep.subr.bf16.mxu1 %v3729_v1  ;;  %v3813_v18 = vld [vmem:[#allocation8 + $0x62c] ss:$16 sps:$4 sm:$0xff]   ;;  %v3808_v1 = vld [vmem:[#allocation8 + $0x5e8] ss:$16 sps:$4 sm:$0xff]  }
 0x194   :  { %2222 = vmatpush2.bf16.msra.mxu0 %v3724_v2  ;;  %2261 = vmatpush2.bf16.msra.mxu1 %v3727_v3  ;;  %v3811_v2 = vld [vmem:[#allocation8 + $0x628] ss:$16 sps:$4 sm:$0xff]   ;;  %v3816_v3 = vld [vmem:[#allocation8 + $0x5cc] ss:$16 sps:$4 sm:$0xff]  }
 0x195   :  { %2223 = vmatprep.subr.bf16.mxu0 %v3732_v29  ;;  %2262 = vmatprep.subr.bf16.mxu1 %v3735_v4  ;;  %v3819_v29 = vld [vmem:[#allocation8 + $0x60c] ss:$16 sps:$4 sm:$0xff]   ;;  %v3814_v4 = vld [vmem:[#allocation8 + $0x5c8] ss:$16 sps:$4 sm:$0xff]  }
 0x198   :  { %2224 = vmatpush2.bf16.msra.mxu0 %v3730_v5  ;;  %2263 = vmatpush2.bf16.msra.mxu1 %v3733_v6  ;;  %v3817_v5 = vld [vmem:[#allocation8 + $0x608] ss:$16 sps:$4 sm:$0xff]   ;;  %v3822_v6 = vld [vmem:[#allocation8 + $0x5ac] ss:$16 sps:$4 sm:$0xff]  }
 0x199   :  { %2225 = vmatprep.subr.bf16.mxu0 %v3738_v7  ;;  %2264 = vmatprep.subr.bf16.mxu1 %v3741_v9  ;;  %v3825_v7 = vld [vmem:[#allocation8 + $0x7ec] ss:$16 sps:$4 sm:$0xff]   ;;  %v3820_v9 = vld [vmem:[#allocation8 + $0x5a8] ss:$16 sps:$4 sm:$0xff]  }
 0x19c   :  { %2226 = vmatpush2.bf16.msra.mxu0 %v3736_v10  ;;  %2265 = vmatpush2.bf16.msra.mxu1 %v3739_v42  ;;  %v3823_v10 = vld [vmem:[#allocation8 + $0x7e8] ss:$16 sps:$4 sm:$0xff]   ;;  %v3828_v42 = vld [vmem:[#allocation8 + $0x58c] ss:$16 sps:$4 sm:$0xff]  }
 0x19d   :  { %2227 = vmatprep.subr.bf16.mxu0 %v3744_v13  ;;  %2266 = vmatprep.subr.bf16.mxu1 %v3747_v15  ;;  %v3831_v13 = vld [vmem:[#allocation8 + $0x7cc] ss:$16 sps:$4 sm:$0xff]   ;;  %v3826_v15 = vld [vmem:[#allocation8 + $0x588] ss:$16 sps:$4 sm:$0xff]  }
 0x1a0   :  { %2228 = vmatpush2.bf16.msra.mxu0 %v3742_v16  ;;  %2267 = vmatpush2.bf16.msra.mxu1 %v3745_v17  ;;  %v3829_v16 = vld [vmem:[#allocation8 + $0x7c8] ss:$16 sps:$4 sm:$0xff]   ;;  %v3834_v17 = vld [vmem:[#allocation8 + $0x56c] ss:$16 sps:$4 sm:$0xff]  }
 0x1a1   :  { %2229 = vmatprep.subr.bf16.mxu0 %v3750_v19  ;;  %2268 = vmatprep.subr.bf16.mxu1 %v3753_v44  ;;  %v3837_v19 = vld [vmem:[#allocation8 + $0x7ac] ss:$16 sps:$4 sm:$0xff]   ;;  %v3832_v44 = vld [vmem:[#allocation8 + $0x568] ss:$16 sps:$4 sm:$0xff]  }
 0x1a4   :  { %2230 = vmatpush2.bf16.msra.mxu0 %v3748_v56  ;;  %2269 = vmatpush2.bf16.msra.mxu1 %v3751_v20  ;;  %v3835_v56 = vld [vmem:[#allocation8 + $0x7a8] ss:$16 sps:$4 sm:$0xff]   ;;  %v3840_v20 = vld [vmem:[#allocation8 + $0x54c] ss:$16 sps:$4 sm:$0xff]  }
 0x1a5   :  { %2231 = vmatprep.subr.bf16.mxu0 %v3756_v21  ;;  %2270 = vmatprep.subr.bf16.mxu1 %v3759_v22  ;;  %v3843_v21 = vld [vmem:[#allocation8 + $0x78c] ss:$16 sps:$4 sm:$0xff]   ;;  %v3838_v22 = vld [vmem:[#allocation8 + $0x548] ss:$16 sps:$4 sm:$0xff]  }
 0x1a8   :  { %2232 = vmatpush2.bf16.msra.mxu0 %v3754_v23  ;;  %2271 = vmatpush2.bf16.msra.mxu1 %v3757_v24  ;;  %v3841_v23 = vld [vmem:[#allocation8 + $0x788] ss:$16 sps:$4 sm:$0xff]   ;;  %v3846_v24 = vld [vmem:[#allocation8 + $0x52c] ss:$16 sps:$4 sm:$0xff]  }
 0x1a9   :  { %2272 = vmatprep.subr.bf16.mxu1 %v3762_v25  ;;  %2287 = vmatprep.subr.bf16.mxu0 %v3765_v27  ;;  %v3849_v25 = vld [vmem:[#allocation8 + $0x76c] ss:$16 sps:$4 sm:$0xff]   ;;  %v3844_v27 = vld [vmem:[#allocation8 + $0x528] ss:$16 sps:$4 sm:$0xff]  }
 0x1ab   :  { %2234 = vmatmul.mubr.bf16.vlgmr.msra.gmra.mxu0 %v4253_v11  ;;  %v3778_v11 = vld [vmem:[#allocation8 + $0x488] ss:$16 sps:$4 sm:$0xff]  }
 0x1ac   :  { %2273 = vmatpush2.bf16.msra.mxu1 %v3760_v28  ;;  %2288 = vmatpush1.bf16.msra.mxu0 %v3763_v31  ;;  %v3847_v28 = vld [vmem:[#allocation8 + $0x768] ss:$16 sps:$4 sm:$0xff]   ;;  %v3852_v31 = vld [vmem:[#allocation8 + $0x50c] ss:$16 sps:$4 sm:$0xff]  }
 0x1ad   :  { %2319 = vmatprep.mubr.bf16.mxu0 %v4274_v60  ;;  %2274 = vmatprep.subr.bf16.mxu1 %v3768_v8  ;;  %v3786_v60 = vld [vmem:[#allocation8 + $0x46c] ss:$16 sps:$4 sm:$0xff]  }
 0x1ae   :  { %2289 = vmatprep.subr.bf16.mxu0 %v3771_v32  ;;  %v3855_v8 = vld [vmem:[#allocation8 + $0x74c] ss:$16 sps:$4 sm:$0xff]   ;;  %v3850_v32 = vld [vmem:[#allocation8 + $0x508] ss:$16 sps:$4 sm:$0xff]  }
 0x1b0   :  { %2275 = vmatpush2.bf16.msra.mxu1 %v3766_v33  ;;  %2290 = vmatpush1.bf16.msra.mxu0 %v3769_v35  ;;  %v3853_v33 = vld [vmem:[#allocation8 + $0x748] ss:$16 sps:$4 sm:$0xff]   ;;  %v3858_v35 = vld [vmem:[#allocation8 + $0x72c] ss:$16 sps:$4 sm:$0xff]  }
 0x1b1   :  { %2291 = vmatprep.subr.bf16.mxu0 %v3774_v36  ;;  %2330 = vmatprep.subr.bf16.mxu1 %v3777_v37  ;;  %v3864_v36 = vld [vmem:[#allocation10 + $0x74] ss:$8 sps:$4 sm:$0xff]   ;;  %v3856_v37 = vld [vmem:[#allocation8 + $0x728] ss:$16 sps:$4 sm:$0xff]  }
 0x1b3   :  { %2277 = vmatmul.mubr.bf16.vlgmr.msra.gmra.mxu1 %v4265_v34  ;;  %v3790_v34 = vld [vmem:[#allocation8 + $0x448] ss:$16 sps:$4 sm:$0xff]  }
 0x1b4   :  { %2292 = vmatpush1.bf16.msra.mxu0 %v3772_v38  ;;  %2331 = vmatpush1.bf16.msra.mxu1 %v3775_v43  ;;  %v3862_v38 = vld [vmem:[#allocation10 + $0x70] ss:$8 sps:$4 sm:$0xff]   ;;  %v3861_v43 = vld [vmem:[#allocation8 + $0x70c] ss:$16 sps:$4 sm:$0xff]  }
 0x1b5   :  { %2362 = vmatprep.mubr.bf16.mxu1 %v4277_v12  ;;  %2293 = vmatprep.subr.bf16.mxu0 %v3780_v45  ;;  %v3801_v12 = vld [vmem:[#allocation8 + $0x66c] ss:$16 sps:$4 sm:$0xff]  }
 0x1b6   :  { %2332 = vmatprep.subr.bf16.mxu1 %v3783_v46  ;;  %v3867_v45 = vld [vmem:[#allocation10 + $0x64] ss:$8 sps:$4 sm:$0xff]   ;;  %v3859_v46 = vld [vmem:[#allocation8 + $0x708] ss:$16 sps:$4 sm:$0xff]  }
 0x1b8   :  { %2294 = vmatpush1.bf16.msra.mxu0 %v3778_v11  ;;  %2333 = vmatpush1.bf16.msra.mxu1 %v3781_v30  ;;  %v3865_v11 = vld [vmem:[#allocation10 + $0x60] ss:$8 sps:$4 sm:$0xff]   ;;  %v3870_v30 = vld [vmem:[#allocation10 + $0x54] ss:$8 sps:$4 sm:$0xff]  }
 0x1b9   :  { %2295 = vmatprep.subr.bf16.mxu0 %v3786_v60  ;;  %2334 = vmatprep.subr.bf16.mxu1 %v3789_v47  ;;  %v3868_v60 = vld [vmem:[#allocation10 + $0x50] ss:$8 sps:$4 sm:$0xff]   ;;  %v3873_v47 = vld [vmem:[#allocation10 + $0x44] ss:$8 sps:$4 sm:$0xff]  }
 0x1bc   :  { %2296 = vmatpush1.bf16.msra.mxu0 %v3784_v49  ;;  %2335 = vmatpush1.bf16.msra.mxu1 %v3787_v50  ;;  %v3871_v49 = vld [vmem:[#allocation10 + $0x40] ss:$8 sps:$4 sm:$0xff]   ;;  %v3876_v50 = vld [vmem:[#allocation10 + $0x34] ss:$8 sps:$4 sm:$0xff]  }
 0x1bd   :  { %2297 = vmatprep.subr.bf16.mxu0 %v3792_v52  ;;  %2336 = vmatprep.subr.bf16.mxu1 %v3795_v53  ;;  %v3879_v52 = vld [vmem:[#allocation10 + $0x24] ss:$8 sps:$4 sm:$0xff]   ;;  %v3910_v53 = vld [vmem:[#allocation10 + $0x170] ss:$8 sps:$4 sm:$0xff]  }
 0x1c0   :  { %2298 = vmatpush1.bf16.msra.mxu0 %v3790_v34  ;;  %2337 = vmatpush1.bf16.msra.mxu1 %v3793_v54  ;;  %v3912_v34 = vld [vmem:[#allocation10 + $0x174] ss:$8 sps:$4 sm:$0xff]   ;;  %v3915_v54 = vld [vmem:[#allocation10 + $0x164] ss:$8 sps:$4 sm:$0xff]  }
 0x1c1   :  { %2299 = vmatprep.subr.bf16.mxu0 %v3798_v55  ;;  %2338 = vmatprep.subr.bf16.mxu1 %v3801_v12  ;;  %v3877_v55 = vld [vmem:[#allocation10 + $0x20] ss:$8 sps:$4 sm:$0xff]   ;;  %v3882_v12 = vld [vmem:[#allocation10 + $0x14] ss:$8 sps:$4 sm:$0xff]  }
 0x1c4   :  { %2300 = vmatpush1.bf16.msra.mxu0 %v3796_v57  ;;  %2339 = vmatpush1.bf16.msra.mxu1 %v3799_v58  ;;  %v3913_v57 = vld [vmem:[#allocation10 + $0x160] ss:$8 sps:$4 sm:$0xff]   ;;  %v3880_v58 = vld [vmem:[#allocation10 + $0x10] ss:$8 sps:$4 sm:$0xff]  }
 0x1c5   :  { %2301 = vmatprep.subr.bf16.mxu0 %v3804_v59  ;;  %2340 = vmatprep.subr.bf16.mxu1 %v3807_v61  ;;  %v3885_v59 = vld [vmem:[#allocation10 + $0x4] ss:$8 sps:$4 sm:$0xff]   ;;  %v3916_v61 = vld [vmem:[#allocation10 + $0x150] ss:$8 sps:$4 sm:$0xff]  }
 0x1c8   :  { %2302 = vmatpush1.bf16.msra.mxu0 %v3802_v62  ;;  %2341 = vmatpush1.bf16.msra.mxu1 %v3805_v63  ;;  %v3921_v62 = vld [vmem:[#allocation10 + $0x144] ss:$8 sps:$4 sm:$0xff]   ;;  %v3883_v63 = vld [vmem:[#allocation10] ss:$8 sps:$4 sm:$0xff]  }
 0x1c9   :  { %2303 = vmatprep.subr.bf16.mxu0 %v3810_v0  ;;  %2342 = vmatprep.subr.bf16.mxu1 %v3813_v18  ;;  %v3888_v0 = vld [vmem:[#allocation10 + $0xf4] ss:$8 sps:$4 sm:$0xff]   ;;  %v3919_v18 = vld [vmem:[#allocation10 + $0x140] ss:$8 sps:$4 sm:$0xff]  }
 0x1cc   :  { %2304 = vmatpush2.bf16.msra.mxu0 %v3808_v1  ;;  %2343 = vmatpush1.bf16.msra.mxu1 %v3811_v2  ;;  %v3924_v1 = vld [vmem:[#allocation10 + $0x134] ss:$8 sps:$4 sm:$0xff]   ;;  %v3886_v2 = vld [vmem:[#allocation10 + $0xf0] ss:$8 sps:$4 sm:$0xff]  }
 0x1cd   :  { %2305 = vmatprep.subr.bf16.mxu0 %v3816_v3  ;;  %2344 = vmatprep.subr.bf16.mxu1 %v3819_v29  ;;  %v3891_v3 = vld [vmem:[#allocation10 + $0xe4] ss:$8 sps:$4 sm:$0xff]   ;;  %v3922_v29 = vld [vmem:[#allocation10 + $0x130] ss:$8 sps:$4 sm:$0xff]  }
 0x1d0   :  { %2306 = vmatpush2.bf16.msra.mxu0 %v3814_v4  ;;  %2345 = vmatpush1.bf16.msra.mxu1 %v3817_v5  ;;  %v3927_v4 = vld [vmem:[#allocation10 + $0x124] ss:$8 sps:$4 sm:$0xff]   ;;  %v3889_v5 = vld [vmem:[#allocation10 + $0xe0] ss:$8 sps:$4 sm:$0xff]  }
 0x1d1   :  { %2307 = vmatprep.subr.bf16.mxu0 %v3822_v6  ;;  %2346 = vmatprep.subr.bf16.mxu1 %v3825_v7  ;;  %v3894_v6 = vld [vmem:[#allocation10 + $0xd4] ss:$8 sps:$4 sm:$0xff]   ;;  %v3925_v7 = vld [vmem:[#allocation10 + $0x120] ss:$8 sps:$4 sm:$0xff]  }
 0x1d4   :  { %2308 = vmatpush2.bf16.msra.mxu0 %v3820_v9  ;;  %2347 = vmatpush2.bf16.msra.mxu1 %v3823_v10  ;;  %v3930_v9 = vld [vmem:[#allocation10 + $0x114] ss:$8 sps:$4 sm:$0xff]   ;;  %v3892_v10 = vld [vmem:[#allocation10 + $0xd0] ss:$8 sps:$4 sm:$0xff]  }
 0x1d5   :  { %2309 = vmatprep.subr.bf16.mxu0 %v3828_v42  ;;  %2348 = vmatprep.subr.bf16.mxu1 %v3831_v13  ;;  %v3897_v42 = vld [vmem:[#allocation10 + $0xc4] ss:$8 sps:$4 sm:$0xff]   ;;  %v3928_v13 = vld [vmem:[#allocation10 + $0x110] ss:$8 sps:$4 sm:$0xff]  }
 0x1d8   :  { %2310 = vmatpush2.bf16.msra.mxu0 %v3826_v15  ;;  %2349 = vmatpush2.bf16.msra.mxu1 %v3829_v16  ;;  %v3933_v15 = vld [vmem:[#allocation10 + $0x104] ss:$8 sps:$4 sm:$0xff]   ;;  %v3895_v16 = vld [vmem:[#allocation10 + $0xc0] ss:$8 sps:$4 sm:$0xff]  }
 0x1d9   :  { %2311 = vmatprep.subr.bf16.mxu0 %v3834_v17  ;;  %2350 = vmatprep.subr.bf16.mxu1 %v3837_v19  ;;  %v3900_v17 = vld [vmem:[#allocation10 + $0xb4] ss:$8 sps:$4 sm:$0xff]   ;;  %v3931_v19 = vld [vmem:[#allocation10 + $0x100] ss:$8 sps:$4 sm:$0xff]  }
 0x1dc   :  { %2312 = vmatpush2.bf16.msra.mxu0 %v3832_v44  ;;  %2351 = vmatpush2.bf16.msra.mxu1 %v3835_v56  ;;  %v3936_v44 = vld [vmem:[#allocation10 + $0x1f4] ss:$8 sps:$4 sm:$0xff]   ;;  %v3898_v56 = vld [vmem:[#allocation10 + $0xb0] ss:$8 sps:$4 sm:$0xff]  }
 0x1dd   :  { %2313 = vmatprep.subr.bf16.mxu0 %v3840_v20  ;;  %2352 = vmatprep.subr.bf16.mxu1 %v3843_v21  ;;  %v3903_v20 = vld [vmem:[#allocation10 + $0xa4] ss:$8 sps:$4 sm:$0xff]   ;;  %v3934_v21 = vld [vmem:[#allocation10 + $0x1f0] ss:$8 sps:$4 sm:$0xff]  }
 0x1e0   :  { %2314 = vmatpush2.bf16.msra.mxu0 %v3838_v22  ;;  %2353 = vmatpush2.bf16.msra.mxu1 %v3841_v23  ;;  %v3939_v22 = vld [vmem:[#allocation10 + $0x1e4] ss:$8 sps:$4 sm:$0xff]   ;;  %v3901_v23 = vld [vmem:[#allocation10 + $0xa0] ss:$8 sps:$4 sm:$0xff]  }
 0x1e1   :  { %2315 = vmatprep.subr.bf16.mxu0 %v3846_v24  ;;  %2354 = vmatprep.subr.bf16.mxu1 %v3849_v25  ;;  %v3906_v25 = vld [vmem:[#allocation10 + $0x94] ss:$8 sps:$4 sm:$0xff]  }
 0x1e4   :  { %2316 = vmatpush2.bf16.msra.mxu0 %v3844_v27  ;;  %2355 = vmatpush2.bf16.msra.mxu1 %v3847_v28  ;;  %v3937_v27 = vld [vmem:[#allocation10 + $0x1e0] ss:$8 sps:$4 sm:$0xff]   ;;  %v3904_v28 = vld [vmem:[#allocation10 + $0x90] ss:$8 sps:$4 sm:$0xff]  }
 0x1e5   :  { %2317 = vmatprep.subr.bf16.mxu0 %v3852_v31  ;;  %2356 = vmatprep.subr.bf16.mxu1 %v3855_v8  ;;  %v3909_v8 = vld [vmem:[#allocation10 + $0x84] ss:$8 sps:$4 sm:$0xff]  }
 0x1e8   :  { %2318 = vmatpush2.bf16.msra.mxu0 %v3850_v32  ;;  %2357 = vmatpush2.bf16.msra.mxu1 %v3853_v33  ;;  %v3907_v32 = vld [vmem:[#allocation10 + $0x80] ss:$8 sps:$4 sm:$0xff]  }
 0x1e9   :  { %2358 = vmatprep.subr.bf16.mxu1 %v3858_v35  ;;  %2789 = vmatprep.subr.bf16.mxu0 %v3864_v36 }
 0x1eb   :  { %2320 = vmatmul.mubr.bf16.vlgmr.msra.gmra.mxu0 %v4288_v14  ;;  %v3874_v14 = vld [vmem:[#allocation10 + $0x30] ss:$8 sps:$4 sm:$0xff]   ;;  %v2063_v24 = vpop.f32.mrf.mxu0 }
 0x1ec   :  { %2359 = vmatpush2.bf16.msra.mxu1 %v3856_v37  ;;  %2790 = vmatpush1.bf16.msra.mxu0 %v3862_v38  ;;  %v4305_v38 = vld [vmem:[%s4335_s4] sm:$0xf] }
 0x1ed   :  { %2360 = vmatprep.subr.bf16.mxu1 %v3861_v43  ;;  %2791 = vmatprep.subr.bf16.mxu0 %v3867_v45  ;;  %v2065_v31 = vpop.f32.mrf.mxu0  ;;  %v3942_v43 = vld [vmem:[#allocation10 + $0x1d4] ss:$8 sps:$4 sm:$0xff]  }
 0x1ef   :  { %v2067_v33 = vpop.f32.mrf.mxu0 }
 0x1f0   :  { %2361 = vmatpush2.bf16.msra.mxu1 %v3859_v46  ;;  %2792 = vmatpush1.bf16.msra.mxu0 %v3865_v11  ;;  %v3940_v46 = vld [vmem:[#allocation10 + $0x1d0] ss:$8 sps:$4 sm:$0xff]   ;;  %v736_v11 = vrot.slane %v4305_v38, %v4231_v40 }
 0x1f1   :  { %2793 = vmatprep.subr.bf16.mxu0 %v3870_v30  ;;  %2832 = vmatprep.subr.bf16.mxu1 %v3912_v34  ;;  %v2069_v36 = vpop.f32.mrf.mxu0  ;;  %v732_v30 = vrot.slane %v4305_v38, %v4234_v41 }
 0x1f3   :  { %2363 = vmatmul.mubr.bf16.vlgmr.msra.gmra.mxu1 %v4292_v26  ;;  %v3918_v26 = vld [vmem:[#allocation10 + $0x154] ss:$8 sps:$4 sm:$0xff]   ;;  %v2106_v35 = vpop.f32.mrf.mxu1 }
 0x1f4   :  { %2794 = vmatpush1.bf16.msra.mxu0 %v3868_v60  ;;  %2833 = vmatpush1.bf16.msra.mxu1 %v3910_v53 }
 0x1f5   :  { %2795 = vmatprep.subr.bf16.mxu0 %v3873_v47  ;;  %2834 = vmatprep.subr.bf16.mxu1 %v3915_v54  ;;  %v2108_v37 = vpop.f32.mrf.mxu1  ;;  %v2068_v54 = vadd.f32 %v2067_v33, %v732_v30  ;;  %v3962_v33 = vld [vmem:[#allocation11 + $0x68] sm:$0xff]  }
 0x1f7   :  { %v2110_v60 = vpop.f32.mrf.mxu1 }
 0x1f8   :  { %2796 = vmatpush1.bf16.msra.mxu0 %v3871_v49  ;;  %2835 = vmatpush1.bf16.msra.mxu1 %v3913_v57  ;;  %v3945_v49 = vld [vmem:[#allocation10 + $0x1c4] ss:$8 sps:$4 sm:$0xff]  }
 0x1f9   :  { %2797 = vmatprep.subr.bf16.mxu0 %v3876_v50  ;;  %2836 = vmatprep.subr.bf16.mxu1 %v3918_v26  ;;  %v3943_v50 = vld [vmem:[#allocation10 + $0x1c0] ss:$8 sps:$4 sm:$0xff]   ;;  %v2112_v53 = vpop.f32.mrf.mxu1 }
 0x1fc   :  { %2798 = vmatpush1.bf16.msra.mxu0 %v3874_v14  ;;  %2837 = vmatpush1.bf16.msra.mxu1 %v3916_v61  ;;  %v2066_v14 = vadd.f32 %v2065_v31, %v736_v11  ;;  %v2111_v61 = vadd.f32 %v2110_v60, %v2068_v54  ;;  %v3959_v31 = vld [vmem:[#allocation11 + $0x38] sm:$0xff]  }
 0x1fd   :  { %2799 = vmatprep.subr.bf16.mxu0 %v3879_v52  ;;  %2838 = vmatprep.subr.bf16.mxu1 %v3921_v62  ;;  %v2064_v52 = vadd.f32 %v2063_v24, %v732_v30 }
 0x1ff   :  { %v2107_v57 = vadd.f32 %v2106_v35, %v2064_v52  ;;  %v3963_v35 = vld [vmem:[#allocation11 + $0x28] sm:$0xff]  }
 0x200   :  { %2800 = vmatpush1.bf16.msra.mxu0 %v3877_v55  ;;  %2839 = vmatpush1.bf16.msra.mxu1 %v3919_v18  ;;  %v2109_v55 = vadd.f32 %v2108_v37, %v2066_v14  ;;  %v3965_v37 = vld [vmem:[#allocation11 + $0x20] sm:$0xff]  }
 0x201   :  { %2801 = vmatprep.subr.bf16.mxu0 %v3882_v12  ;;  %2840 = vmatprep.subr.bf16.mxu1 %v3924_v1  ;;  %v3948_v12 = vld [vmem:[#allocation10 + $0x1b4] ss:$8 sps:$4 sm:$0xff]  }
 0x204   :  { %2802 = vmatpush1.bf16.msra.mxu0 %v3880_v58  ;;  %2841 = vmatpush1.bf16.msra.mxu1 %v3922_v29  ;;  %v3946_v58 = vld [vmem:[#allocation10 + $0x1b0] ss:$8 sps:$4 sm:$0xff]   ;;  %v3951_v29 = vld [vmem:[#allocation10 + $0x1a4] ss:$8 sps:$4 sm:$0xff]  }
 0x205   :  { %2803 = vmatprep.subr.bf16.mxu0 %v3885_v59  ;;  %2842 = vmatprep.subr.bf16.mxu1 %v3927_v4  ;;  %v2070_v59 = vadd.f32 %v2069_v36, %v736_v11  ;;  %v3964_v36 = vld [vmem:[#allocation11 + $0x60] sm:$0xff]  }
 0x207   :  { %v2113_v1 = vadd.f32 %v2112_v53, %v2070_v59 }
 0x208   :  { %2804 = vmatpush1.bf16.msra.mxu0 %v3883_v63  ;;  %2843 = vmatpush1.bf16.msra.mxu1 %v3925_v7 }
 0x209   :  { %2805 = vmatprep.subr.bf16.mxu0 %v3888_v0  ;;  %2844 = vmatprep.subr.bf16.mxu1 %v3930_v9 }
 0x20c   :  { %2806 = vmatpush2.bf16.msra.mxu0 %v3886_v2  ;;  %2845 = vmatpush1.bf16.msra.mxu1 %v3928_v13 }
 0x20d   :  { %2807 = vmatprep.subr.bf16.mxu0 %v3891_v3  ;;  %2846 = vmatprep.subr.bf16.mxu1 %v3933_v15 }
 0x210   :  { %2808 = vmatpush2.bf16.msra.mxu0 %v3889_v5  ;;  %2847 = vmatpush1.bf16.msra.mxu1 %v3931_v19  ;;  %v3952_v19 = vld [vmem:[#allocation10 + $0x190] ss:$8 sps:$4 sm:$0xff]  }
 0x211   :  { %2809 = vmatprep.subr.bf16.mxu0 %v3894_v6  ;;  %2848 = vmatprep.subr.bf16.mxu1 %v3936_v44  ;;  %v3949_v6 = vld [vmem:[#allocation10 + $0x1a0] ss:$8 sps:$4 sm:$0xff]  }
 0x214   :  { %2810 = vmatpush2.bf16.msra.mxu0 %v3892_v10  ;;  %2849 = vmatpush2.bf16.msra.mxu1 %v3934_v21 }
 0x215   :  { %2811 = vmatprep.subr.bf16.mxu0 %v3897_v42  ;;  %2850 = vmatprep.subr.bf16.mxu1 %v3939_v22  ;;  %v3955_v22 = vld [vmem:[#allocation10 + $0x180] ss:$8 sps:$4 sm:$0xff]  }
 0x218   :  { %2812 = vmatpush2.bf16.msra.mxu0 %v3895_v16  ;;  %2851 = vmatpush2.bf16.msra.mxu1 %v3937_v27  ;;  %v3954_v16 = vld [vmem:[#allocation10 + $0x194] ss:$8 sps:$4 sm:$0xff]  }
 0x219   :  { %2813 = vmatprep.subr.bf16.mxu0 %v3900_v17  ;;  %2852 = vmatprep.subr.bf16.mxu1 %v3942_v43 }
 0x21c   :  { %2814 = vmatpush2.bf16.msra.mxu0 %v3898_v56  ;;  %2853 = vmatpush2.bf16.msra.mxu1 %v3940_v46 }
 0x21d   :  { %2815 = vmatprep.subr.bf16.mxu0 %v3903_v20  ;;  %2854 = vmatprep.subr.bf16.mxu1 %v3945_v49  ;;  %v744_v49 = vrot.slane %v4305_v38, %v149_v48 }
 0x220   :  { %2816 = vmatpush2.bf16.msra.mxu0 %v3901_v23  ;;  %2855 = vmatpush2.bf16.msra.mxu1 %v3943_v50  ;;  %v3957_v23 = vld [vmem:[#allocation10 + $0x184] ss:$8 sps:$4 sm:$0xff]   ;;  %v740_v50 = vrot.slane %v4305_v38, %v145_v51 }
 0x221   :  { %2817 = vmatprep.subr.bf16.mxu0 %v3906_v25  ;;  %2856 = vmatprep.subr.bf16.mxu1 %v3948_v12 }
 0x224   :  { %2818 = vmatpush2.bf16.msra.mxu0 %v3904_v28  ;;  %2857 = vmatpush2.bf16.msra.mxu1 %v3946_v58  ;;  %v3958_v28 = vld [vmem:[#allocation11 + $0x78] sm:$0xff]  }
 0x225   :  { %2819 = vmatprep.subr.bf16.mxu0 %v3909_v8  ;;  %2858 = vmatprep.subr.bf16.mxu1 %v3951_v29  ;;  %v3960_v8 = vld [vmem:[#allocation11 + $0x70] sm:$0xff]  }
 0x228   :  { %2820 = vmatpush2.bf16.msra.mxu0 %v3907_v32  ;;  %2859 = vmatpush2.bf16.msra.mxu1 %v3949_v6  ;;  %v3961_v32 = vld [vmem:[#allocation11 + $0x30] sm:$0xff]  }
 0x229   :  { %2860 = vmatprep.subr.bf16.mxu1 %v3954_v16  ;;  %3440 = vmatprep.subr.bf16.mxu0 %v3958_v28  ;;  %v2457_v28 = vld [vmem:[%s4337_s6] sm:$0x3] }
 0x22b   :  { %v2149_v45 = vpop.f32.mrf.mxu0 }
 0x22c   :  { %v2150_v63 = vadd.f32 %v2149_v45, %v2107_v57  ;;  %2861 = vmatpush2.bf16.msra.mxu1 %v3952_v19  ;;  %v3966_v19 = vld [vmem:[#allocation11 + $0x58] sm:$0xff]  }
 0x22d   :  { %v2151_v47 = vpop.f32.mrf.mxu0  ;;  %2862 = vmatprep.subr.bf16.mxu1 %v3957_v23  ;;  %v3972_v23 = vld [vmem:[#allocation11 + $0x40] sm:$0xff]  }
 0x22e   :  { %v2152_v62 = vadd.f32 %v2151_v47, %v2109_v55 }
 0x22f   :  { %v2153_v34 = vpop.f32.mrf.mxu0 }
 0x230   :  { %v2154_v2 = vadd.f32 %v2153_v34, %v2111_v61  ;;  %2863 = vmatpush2.bf16.msra.mxu1 %v3955_v22  ;;  %v3971_v22 = vld [vmem:[#allocation11 + $0x8] sm:$0xff]  }
 0x231   :  { %v2155_v0 = vpop.f32.mrf.mxu0 }
 0x232   :  { %v2156_v7 = vadd.f32 %v2155_v0, %v2113_v1 }
 0x233   :  { %v2192_v26 = vpop.f32.mrf.mxu1 }
 0x234   :  { %v2193_v4 = vadd.f32 %v2192_v26, %v2150_v63 }
 0x235   :  { %v2194_v18 = vpop.f32.mrf.mxu1 }
 0x236   :  { %v2195_v3 = vadd.f32 %v2194_v18, %v2152_v62  ;;  %v2373_v17 = vmul.f32 0.01, %v2193_v4 }
 0x237   :  { %v2196_v5 = vpop.f32.mrf.mxu1 }
 0x238   :  { %v2197_v9 = vadd.f32 %v2196_v5, %v2154_v2  ;;  %v2374_v42 = vmul.f32 0.01, %v2195_v3  ;;  %v2381_v24 = vmax.f32 %v2193_v4, %v2373_v17 }
 0x239   :  { %v2198_v10 = vpop.f32.mrf.mxu1 }
 0x23a   :  { %v2377_v13 = vmul.f32 0.01, %v2197_v9  ;;  %v2199_v15 = vadd.f32 %v2198_v10, %v2156_v7  ;;  %v2382_v20 = vmax.f32 %v2195_v3, %v2374_v42 }
 0x23c   :  { %v2378_v44 = vmul.f32 0.01, %v2199_v15  ;;  %v2385_v56 = vmax.f32 %v2197_v9, %v2377_v13 }
 0x23e   :  { %v2386_v21 = vmax.f32 %v2199_v15, %v2378_v44  ;;  %v2389_v27 = vpack.c.bf16 %v2385_v56, %v2381_v24  ;;  %v3967_v44 = vld [vmem:[#allocation11 + $0x18] sm:$0xff]   ;;  %v3968_v56 = vld [vmem:[#allocation11 + $0x50] sm:$0xff]   ;;  %v3973_v24 = vld [vmem:[#allocation11] sm:$0xff]  }
 0x240   :  { %v2390_v25 = vpack.c.bf16 %v2386_v21, %v2382_v20  ;;  %v3969_v20 = vld [vmem:[#allocation11 + $0x10] sm:$0xff]   ;;  %v3970_v21 = vld [vmem:[#allocation11 + $0x48] sm:$0xff]  }
 0x242   :  { %2821 = vmatprep.mubr.bf16.mxu0 %v2390_v25 }
 0x243   :  { %2822 = vmatmul.mubr.bf16.vlgmr.msra.gmra.mxu0 %v2389_v27 }
 0x244   :  { %3441 = vmatpush3.bf16.msra.mxu0 %v3959_v31  ;;  %v2466_v31 = vrot.slane %v2457_v28, %v4231_v40 }
 0x245   :  { %3442 = vmatprep.subr.bf16.mxu0 %v3960_v8  ;;  %v2462_v8 = vrot.slane %v2457_v28, %v4234_v41 }
 0x248   :  { %3443 = vmatpush3.bf16.msra.mxu0 %v3961_v32 }
 0x249   :  { %3444 = vmatprep.subr.bf16.mxu0 %v3962_v33 }
 0x24c   :  { %3445 = vmatpush3.bf16.msra.mxu0 %v3963_v35 }
 0x24d   :  { %3446 = vmatprep.subr.bf16.mxu0 %v3964_v36 }
 0x250   :  { %3447 = vmatpush3.bf16.msra.mxu0 %v3965_v37 }
 0x251   :  { %3448 = vmatprep.subr.bf16.mxu0 %v3966_v19 }
 0x254   :  { %3449 = vmatpush3.bf16.msra.mxu0 %v3967_v44 }
 0x255   :  { %3450 = vmatprep.subr.bf16.mxu0 %v3968_v56 }
 0x258   :  { %3451 = vmatpush3.bf16.msra.mxu0 %v3969_v20 }
 0x259   :  { %3452 = vmatprep.subr.bf16.mxu0 %v3970_v21 }
 0x25c   :  { %3453 = vmatpush3.bf16.msra.mxu0 %v3971_v22 }
 0x25d   :  { %3454 = vmatprep.subr.bf16.mxu0 %v3972_v23 }
 0x260   :  { %3455 = vmatpush3.bf16.msra.mxu0 %v3973_v24 }
 0x26b   :  { %v2235_v43 = vpop.f32.mrf.mxu0 }
 0x26c   :  { %v2236_v34 = vadd.f32 %v2235_v43, %v740_v50 }
 0x26d   :  { %v2237_v45 = vpop.f32.mrf.mxu0 }
 0x26e   :  { %v2238_v53 = vadd.f32 %v2237_v45, %v744_v49 }
 0x26f   :  { %v2239_v46 = vpop.f32.mrf.mxu0 }
 0x270   :  { %v2240_v12 = vadd.f32 %v2239_v46, %v740_v50 }
 0x271   :  { %v2241_v30 = vpop.f32.mrf.mxu0 }
 0x272   :  { %v2242_v59 = vadd.f32 %v2241_v30, %v744_v49 }
 0x273   :  { %v2278_v11 = vpop.f32.mrf.mxu1 }
 0x274   :  { %v2279_v26 = vadd.f32 %v2278_v11, %v2236_v34 }
 0x275   :  { %v2280_v60 = vpop.f32.mrf.mxu1 }
 0x276   :  { %v2281_v57 = vadd.f32 %v2280_v60, %v2238_v53 }
 0x277   :  { %v2282_v14 = vpop.f32.mrf.mxu1 }
 0x278   :  { %v2283_v61 = vadd.f32 %v2282_v14, %v2240_v12 }
 0x279   :  { %v2284_v54 = vpop.f32.mrf.mxu1 }
 0x27a   :  { %v2285_v18 = vadd.f32 %v2284_v54, %v2242_v59 }
 0x2ab   :  { %v2321_v47 = vpop.f32.mrf.mxu0 }
 0x2ac   :  { %v2322_v63 = vadd.f32 %v2321_v47, %v2279_v26 }
 0x2ad   :  { %v2323_v52 = vpop.f32.mrf.mxu0 }
 0x2ae   :  { %v2324_v62 = vadd.f32 %v2323_v52, %v2281_v57 }
 0x2af   :  { %v2325_v55 = vpop.f32.mrf.mxu0 }
 0x2b0   :  { %v2326_v39 = vadd.f32 %v2325_v55, %v2283_v61 }
 0x2b1   :  { %v2327_v0 = vpop.f32.mrf.mxu0 }
 0x2b2   :  { %v2328_v2 = vadd.f32 %v2327_v0, %v2285_v18 }
 0x2b3   :  { %v2364_v58 = vpop.f32.mrf.mxu1 }
 0x2b4   :  { %v2365_v51 = vadd.f32 %v2364_v58, %v2322_v63  ;;  %v3423_v58 = vld [vmem:[%s4339_s8] ss:$0 sm:$0xff] }
 0x2b5   :  { %v2366_v48 = vpop.f32.mrf.mxu1 }
 0x2b6   :  { %v2367_v1 = vadd.f32 %v2366_v48, %v2324_v62  ;;  %v2375_v7 = vmul.f32 0.01, %v2365_v51 }
 0x2b7   :  { %v2368_v38 = vpop.f32.mrf.mxu1 }
 0x2b8   :  { %v2369_v3 = vadd.f32 %v2368_v38, %v2326_v39  ;;  %v2376_v4 = vmul.f32 0.01, %v2367_v1  ;;  %v2383_v15 = vmax.f32 %v2365_v51, %v2375_v7 }
 0x2b9   :  { %v2370_v29 = vpop.f32.mrf.mxu1 }
 0x2ba   :  { %v2379_v5 = vmul.f32 0.01, %v2369_v3  ;;  %v2371_v6 = vadd.f32 %v2370_v29, %v2328_v2  ;;  %v2384_v42 = vmax.f32 %v2367_v1, %v2376_v4 }
 0x2bc   :  { %v2380_v9 = vmul.f32 0.01, %v2371_v6  ;;  %v2387_v10 = vmax.f32 %v2369_v3, %v2379_v5 }
 0x2be   :  { %v2388_v13 = vmax.f32 %v2371_v6, %v2380_v9  ;;  %v2391_v17 = vpack.c.bf16 %v2387_v10, %v2383_v15 }
 0x2c0   :  { %v2392_v16 = vpack.c.bf16 %v2388_v13, %v2384_v42 }
 0x2c2   :  { %2864 = vmatprep.mubr.bf16.mxu1 %v2392_v16 }
 0x2c3   :  { %2865 = vmatmul.mubr.bf16.vlgmr.msra.gmra.mxu1 %v2391_v17 }
 0x303   :  { %v2823_v25 = vpop.f32.mrf.mxu0 }
 0x304   :  { %v2824_v36 = vadd.f32 %v2823_v25, %v2462_v8 }
 0x305   :  { %v2825_v27 = vpop.f32.mrf.mxu0 }
 0x306   :  { %v2826_v35 = vadd.f32 %v2825_v27, %v2466_v31 }
 0x307   :  { %v2827_v32 = vpop.f32.mrf.mxu0 }
 0x308   :  { %v2828_v45 = vadd.f32 %v2827_v32, %v2462_v8 }
 0x309   :  { %v2829_v37 = vpop.f32.mrf.mxu0 }
 0x30a   :  { %v2830_v60 = vadd.f32 %v2829_v37, %v2466_v31 }
 0x383   :  { %v2866_v33 = vpop.f32.mrf.mxu1 }
 0x384   :  { %v2867_v11 = vadd.f32 %v2866_v33, %v2824_v36 }
 0x385   :  { %v2868_v43 = vpop.f32.mrf.mxu1 }
 0x386   :  { %v2869_v46 = vadd.f32 %v2868_v43, %v2826_v35  ;;  %v2875_v53 = vmul.f32 0.01, %v2867_v11 }
 0x387   :  { %v2870_v30 = vpop.f32.mrf.mxu1 }
 0x388   :  { %v2871_v47 = vadd.f32 %v2870_v30, %v2828_v45  ;;  %v2876_v50 = vmul.f32 0.01, %v2869_v46  ;;  %v2879_v55 = vmax.f32 %v2867_v11, %v2875_v53 }
 0x389   :  { %v2872_v49 = vpop.f32.mrf.mxu1 }
 0x38a   :  { %v2877_v14 = vmul.f32 0.01, %v2871_v47  ;;  %v2873_v52 = vadd.f32 %v2872_v49, %v2830_v60  ;;  %v2880_v41 = vmax.f32 %v2869_v46, %v2876_v50 }
 0x38c   :  { %v2878_v40 = vmul.f32 0.01, %v2873_v52  ;;  %v2881_v34 = vmax.f32 %v2871_v47, %v2877_v14 }
 0x38e   :  { %v2882_v54 = vmax.f32 %v2873_v52, %v2878_v40  ;;  %v2883_v57 = vpack.c.bf16 %v2881_v34, %v2879_v55 }
 0x390   :  { %v2884_v12 = vpack.c.bf16 %v2882_v54, %v2880_v41 }
 0x392   :  { %3052 = vmatprep.mubr.bf16.mxu0 %v2884_v12 }
 0x393   :  { %3053 = vmatmul.mubr.bf16.vlgmr.msra.gmra.mxu0 %v2883_v57 }
 0x453   :  { %v3456_v26 = vpop.f32.mrf.mxu0 }
 0x455   :  { %v3457_v59 = vpop.f32.mrf.mxu0 }
 0x456   :  { %v3458_v61 = vadd.f32 %v3457_v59, %v3456_v26 }
 0x457   :  { %v3459_v62 = vpop.f32.mrf.mxu0 }
 0x458   :  { %v3055_v63 = vadd.f32 %v3458_v61, %v3423_v58 }
 0x459   :  { %v3460_v0 = vpop.f32.mrf.mxu0 }
 0x45a   :  { %3061 = vst [vmem:[#allocation13] sm:$0xff] %v3055_v63  ;;  %v3461_v48 = vadd.f32 %v3460_v0, %v3459_v62 }
 0x45c   :  { %v3058_v18 = vadd.f32 %v3461_v48, %v3423_v58 }
 0x45e   :  { %3062 = vst [vmem:[#allocation13 + $0x8] sm:$0xff] %v3058_v18 }
 0x45f   :  { %4105 = shalt.err (!%p4102_p6)
}
 0x460   :  { %3074 = dma.vmem_to_hbm [thread:$0]  %s3069_s1, 256, %s4340_s9, [#allocation4], %s4131_s25, %s4131_s25, %s4132_s26  }
 0x461   :  { %4122 = dma.done.wait [#allocation4], 256  }
 0x462   :  { %4123 = vsyncadd [#allocation4], 4294967040 }
 0x463   :  { %3078 = vsyncpa [#allocation3], 1 }
 0x464   :  { %3079 = vsyncpa [#allocation6], 1 }
 0x465   :  { %3080 = vsyncpa [#allocation9], 1 }
 0x466   :  { %3081 = vsyncpa [#allocation12], 1 }
 0x467   :  { %3082 = vsyncpa [#allocation4], 1 }

</bundles_post_ra>
